<compile_context>
chip_gen: v7x
topology: tpu7x:2x2x1
jax: 0.10.0
libtpu: 0.0.40
codegen_flags: <defaults>
</compile_context>

<pallas_src>
import functools
import math

import jax
import jax.numpy as jnp
from jax.experimental import pallas as pl
from jax.experimental.pallas import tpu as pltpu


def _softplus(x):
    # numerically stable log(1 + exp(x)); equals the torch expression for the
    # usual (negative) rho range and is safe for large |rho|.
    return jnp.maximum(x, 0.0) + jnp.log1p(jnp.exp(-jnp.abs(x)))


def _gauss_kl_cols(mu, std, prior_mu, prior_sigma):
    """Per-column sum of KL( N(mu, std^2) || N(prior_mu, prior_sigma^2) ).

    mu/std have shape (rows, cols); returns (1, cols)."""
    inv_two_pvar = 0.5 / (prior_sigma * prior_sigma)   # python const, no per-elem divide
    log_p_sigma = math.log(prior_sigma)                # python const
    diff = mu if prior_mu == 0.0 else mu - prior_mu    # trace-time dead-code elim
    terms = (log_p_sigma - jnp.log(std)
             + (std * std + diff * diff) * inv_two_pvar - 0.5)
    return jnp.sum(terms, axis=0, keepdims=True)


def _bayes_linear_kernel(prior_mu, prior_sigma,
                         x_ref, wmu_ref, wrho_ref, weps_ref,
                         bmu_ref, brho_ref, beps_ref,
                         out_ref, kl_ref):
    i = pl.program_id(1)          # batch tile (usually a single full-batch tile)
    k = pl.program_id(2)          # d_in reduction tile (innermost)

    # ---- sampled weight tile (f32 math), fed to the MXU in x's dtype --------
    w_std = _softplus(wrho_ref[...])
    w_sample = wmu_ref[...] + weps_ref[...] * w_std
    contrib = jnp.dot(x_ref[...], w_sample.astype(x_ref.dtype),
                      preferred_element_type=jnp.float32)

    # ---- output accumulation: fold the sampled bias into the k == 0 write ---
    @pl.when(k == 0)
    def _():
        b_sample = bmu_ref[...] + beps_ref[...] * _softplus(brho_ref[...])
        out_ref[...] = contrib + b_sample       # broadcast over batch rows

    @pl.when(k != 0)
    def _():
        out_ref[...] += contrib

    # ---- KL(q || prior) as per-column partials; each tile counted once ------
    @pl.when(i == 0)
    def _():
        kl_w = _gauss_kl_cols(wmu_ref[...], w_std, prior_mu, prior_sigma)

        @pl.when(k == 0)
        def _():
            b_std = _softplus(brho_ref[...])
            kl_b = _gauss_kl_cols(bmu_ref[...], b_std, prior_mu, prior_sigma)
            kl_ref[...] = (kl_w + kl_b)[None]

        @pl.when(k != 0)
        def _():
            kl_ref[...] += kl_w[None]


def _pick_tile(dim, candidates):
    for c in candidates:
        if dim % c == 0:
            return c
    return dim    # full-extent block (always legal)


def _pick_batch_tile(n, cap=512):
    if n <= cap:
        return n  # whole batch resident -> weights sampled / streamed exactly once
    return _pick_tile(n, (512, 256, 128, 64, 32, 16, 8))


def _sample_epsilons(key, d_in, d_out):
    k_w, k_b = jax.random.split(key)
    w_eps = jax.random.normal(k_w, (d_in, d_out), dtype=jnp.float32)
    b_eps = jax.random.normal(k_b, (1, d_out), dtype=jnp.float32)
    return w_eps, b_eps


def bayes_linear_normalq_forward(x, weight_mus, weight_rhos, bias_mus, bias_rhos,
                                 prior_mu, prior_sigma, key, *, sample=True,
                                 block_b=None, block_k=None, block_n=None,
                                 mxu_dtype=jnp.bfloat16):
    """Pallas TPU implementation of BayesLinear_Normalq.forward(x, sample).

    sample=True  -> returns (output, KL_loss_scalar)
    sample=False -> returns output (x @ weight_mus + bias_mus)"""
    n, d_in = x.shape
    assert weight_mus.shape[0] == d_in
    d_out = weight_mus.shape[1]

    if sample:
        weight_eps, bias_eps = _sample_epsilons(key, d_in, d_out)
    else:
        weight_eps = jnp.zeros((d_in, d_out), jnp.float32)
        bias_eps = jnp.zeros((1, d_out), jnp.float32)

    # Tiling: full batch per tile when it fits (<= 512 rows); lane dims are
    # 128-multiples (lane-dense stores), 256-biased for the v6e/v7x 256x256
    # MXU; tn = 256 keeps nj >= 2 for v7x megacore sharding when d_out allows.
    tb = block_b or _pick_batch_tile(n)
    tk = block_k or _pick_tile(d_in, (512, 256, 128))
    tn = block_n or _pick_tile(d_out, (256, 512, 128))
    assert n % tb == 0 and d_in % tk == 0 and d_out % tn == 0
    nj, ni, nk = d_out // tn, n // tb, d_in // tk

    x_in = x.astype(mxu_dtype)
    wmu = weight_mus.astype(jnp.float32)
    wrho = weight_rhos.astype(jnp.float32)
    bmu = bias_mus.reshape(1, d_out).astype(jnp.float32)
    brho = bias_rhos.reshape(1, d_out).astype(jnp.float32)

    kernel = functools.partial(_bayes_linear_kernel, float(prior_mu), float(prior_sigma))

    out, kl_parts = pl.pallas_call(
        kernel,
        grid=(nj, ni, nk),
        in_specs=[
            pl.BlockSpec((tb, tk), lambda j, i, k: (i, k)),   # x (mxu_dtype stream)
            pl.BlockSpec((tk, tn), lambda j, i, k: (k, j)),   # weight_mus
            pl.BlockSpec((tk, tn), lambda j, i, k: (k, j)),   # weight_rhos
            pl.BlockSpec((tk, tn), lambda j, i, k: (k, j)),   # weight_eps
            pl.BlockSpec((1, tn), lambda j, i, k: (0, j)),    # bias_mus
            pl.BlockSpec((1, tn), lambda j, i, k: (0, j)),    # bias_rhos
            pl.BlockSpec((1, tn), lambda j, i, k: (0, j)),    # bias_eps
        ],
        out_specs=(
            pl.BlockSpec((tb, tn), lambda j, i, k: (i, j)),       # output (resident over k)
            pl.BlockSpec((1, 1, tn), lambda j, i, k: (j, 0, 0)),  # per-(j, column) KL partials
        ),
        out_shape=(
            jax.ShapeDtypeStruct((n, d_out), jnp.float32),
            jax.ShapeDtypeStruct((nj, 1, tn), jnp.float32),
        ),
        compiler_params=pltpu.CompilerParams(
            # j (output columns) is independent -> megacore-parallel on v7x.
            # i MUST stay "arbitrary": the KL block's index map ignores i.
            dimension_semantics=("parallel", "arbitrary", "arbitrary")),
    )(x_in, wmu, wrho, weight_eps, bmu, brho, bias_eps)

    if not sample:
        return out
    kl = jnp.sum(kl_parts)
    return out, kl


if __name__ == "__main__":
    # Small, tile-exercising config: 2 output-column tiles x 1 batch tile x
    # 2 reduction tiles so the k==0 / k>0 paths and the KL gating all run.
    input_dim, output_dim = 256, 256
    batch = 64
    prior_mu, prior_sigma = 0.0, 1.0
    blk_k, blk_n = 128, 128

    key = jax.random.PRNGKey(0)
    k_x, k_wmu, k_wrho, k_bmu, k_brho, k_sample = jax.random.split(key, 6)

    # deterministic parameter init matching the torch __init__ ranges
    weight_mus = jax.random.uniform(k_wmu, (input_dim, output_dim),
                                    minval=-0.05, maxval=0.05, dtype=jnp.float32)
    weight_rhos = jax.random.uniform(k_wrho, (input_dim, output_dim),
                                     minval=-3.0, maxval=-2.0, dtype=jnp.float32)
    bias_mus = jax.random.uniform(k_bmu, (output_dim,),
                                  minval=-0.05, maxval=0.05, dtype=jnp.float32)
    bias_rhos = jax.random.uniform(k_brho, (output_dim,),
                                   minval=-3.0, maxval=-2.0, dtype=jnp.float32)
    x = jax.random.normal(k_x, (batch, input_dim), dtype=jnp.float32)

    out, kl = bayes_linear_normalq_forward(
        x, weight_mus, weight_rhos, bias_mus, bias_rhos,
        prior_mu, prior_sigma, k_sample,
        block_k=blk_k, block_n=blk_n)
    jax.block_until_ready((out, kl))

    # ---- pure-JAX reference (same eps draws, same bf16 MXU feed) ------------
    weight_eps, bias_eps = _sample_epsilons(k_sample, input_dim, output_dim)
    w_std = _softplus(weight_rhos)
    b_std = _softplus(bias_rhos.reshape(1, output_dim))
    w_s = weight_mus + weight_eps * w_std
    b_s = bias_mus.reshape(1, output_dim) + bias_eps * b_std
    ref_out = jnp.dot(x.astype(jnp.bfloat16), w_s.astype(jnp.bfloat16),
                      preferred_element_type=jnp.float32) + b_s

    def ref_kl(mu, std):
        return jnp.sum(jnp.log(prior_sigma / std)
                       + (std * std + (mu - prior_mu) ** 2) / (2.0 * prior_sigma ** 2)
                       - 0.5)

    ref_kl_total = ref_kl(weight_mus, w_std) + ref_kl(bias_mus.reshape(1, -1), b_std)

    assert out.shape == (batch, output_dim)
    assert bool(jnp.all(jnp.isfinite(out)))
    assert jnp.allclose(out, ref_out, atol=2e-3, rtol=2e-3), \
        float(jnp.max(jnp.abs(out - ref_out)))
    assert jnp.allclose(kl, ref_kl_total, rtol=3e-4), \
        (float(kl), float(ref_kl_total))

    # sample=False path: plain x @ weight_mus + bias_mus
    out_det = bayes_linear_normalq_forward(
        x, weight_mus, weight_rhos, bias_mus, bias_rhos,
        prior_mu, prior_sigma, k_sample, sample=False,
        block_k=blk_k, block_n=blk_n)
    jax.block_until_ready(out_det)
    ref_det = jnp.dot(x.astype(jnp.bfloat16), weight_mus.astype(jnp.bfloat16),
                      preferred_element_type=jnp.float32) + bias_mus.reshape(1, -1)
    assert jnp.allclose(out_det, ref_det, atol=2e-3, rtol=2e-3)

    print("KERNEL_OK")
</pallas_src>

<mosaic_0001>
module attributes {stable_mosaic.version = 11 : i64} {
  func.func @_bayes_linear_kernel(%arg0: i32, %arg1: i32, %arg2: i32, %arg3: memref<64x128xbf16, #tpu.memory_space<vmem>>, %arg4: memref<128x128xf32, #tpu.memory_space<vmem>>, %arg5: memref<128x128xf32, #tpu.memory_space<vmem>>, %arg6: memref<128x128xf32, #tpu.memory_space<vmem>>, %arg7: memref<1x128xf32, #tpu.memory_space<vmem>>, %arg8: memref<1x128xf32, #tpu.memory_space<vmem>>, %arg9: memref<1x128xf32, #tpu.memory_space<vmem>>, %arg10: memref<64x128xf32, #tpu.memory_space<vmem>>, %arg11: memref<1x1x128xf32, #tpu.memory_space<vmem>>) attributes {dimension_semantics = [#tpu.dimension_semantics<parallel>, #tpu.dimension_semantics<arbitrary>, #tpu.dimension_semantics<arbitrary>], iteration_bounds = array<i64: 2, 1, 2>, scalar_prefetch = 0 : i64, scratch_operands = 0 : i64, tpu.core_type = #tpu.core_type<tc>, window_params = [{transform_indices = @transform_0, window_bounds = array<i64: 64, 128>}, {transform_indices = @transform_1, window_bounds = array<i64: 128, 128>}, {transform_indices = @transform_2, window_bounds = array<i64: 128, 128>}, {transform_indices = @transform_3, window_bounds = array<i64: 128, 128>}, {transform_indices = @transform_4, window_bounds = array<i64: 1, 128>}, {transform_indices = @transform_5, window_bounds = array<i64: 1, 128>}, {transform_indices = @transform_6, window_bounds = array<i64: 1, 128>}, {transform_indices = @transform_7, window_bounds = array<i64: 64, 128>}, {transform_indices = @transform_8, window_bounds = array<i64: 1, 1, 128>}]} {
    %c0 = arith.constant 0 : index
    %c0_0 = arith.constant 0 : index
    %0 = vector.load %arg5[%c0, %c0_0] : memref<128x128xf32, #tpu.memory_space<vmem>>, vector<128x128xf32>
    %cst = arith.constant 0.000000e+00 : f32
    %1 = vector.broadcast %cst : f32 to vector<128x128xf32>
    %2 = arith.maximumf %0, %1 : vector<128x128xf32>
    %3 = math.absf %0 : vector<128x128xf32>
    %cst_1 = arith.constant 0.000000e+00 : f32
    %4 = vector.broadcast %cst_1 : f32 to vector<128x128xf32>
    %5 = arith.subf %4, %3 : vector<128x128xf32>
    %6 = math.exp %5 : vector<128x128xf32>
    %7 = math.log1p %6 : vector<128x128xf32>
    %8 = arith.addf %2, %7 : vector<128x128xf32>
    %c0_2 = arith.constant 0 : index
    %c0_3 = arith.constant 0 : index
    %9 = vector.load %arg4[%c0_2, %c0_3] : memref<128x128xf32, #tpu.memory_space<vmem>>, vector<128x128xf32>
    %c0_4 = arith.constant 0 : index
    %c0_5 = arith.constant 0 : index
    %10 = vector.load %arg6[%c0_4, %c0_5] : memref<128x128xf32, #tpu.memory_space<vmem>>, vector<128x128xf32>
    %11 = arith.mulf %10, %8 : vector<128x128xf32>
    %12 = arith.addf %9, %11 : vector<128x128xf32>
    %c0_6 = arith.constant 0 : index
    %c0_7 = arith.constant 0 : index
    %13 = vector.load %arg3[%c0_6, %c0_7] : memref<64x128xbf16, #tpu.memory_space<vmem>>, vector<64x128xbf16>
    %14 = arith.truncf %12 : vector<128x128xf32> to vector<128x128xbf16>
    %cst_8 = arith.constant dense<0.000000e+00> : vector<64x128xf32>
    %15 = tpu.matmul %13, %14, %cst_8 {dimension_numbers = #tpu.dot_dimension_numbers<[1], [0], [0], [1], [0, 0, 1, 1], [], []>} : vector<64x128xbf16>, vector<128x128xbf16>, vector<64x128xf32> -> vector<64x128xf32>
    %c0_i32 = arith.constant 0 : i32
    %16 = arith.cmpi eq, %arg2, %c0_i32 : i32
    %17 = arith.extui %16 : i1 to i32
    %c0_i32_9 = arith.constant 0 : i32
    %18 = arith.cmpi ne, %17, %c0_i32_9 : i32
    scf.if %18 {
      %c0_14 = arith.constant 0 : index
      %c0_15 = arith.constant 0 : index
      %25 = vector.load %arg7[%c0_14, %c0_15] : memref<1x128xf32, #tpu.memory_space<vmem>>, vector<1x128xf32>
      %c0_16 = arith.constant 0 : index
      %c0_17 = arith.constant 0 : index
      %26 = vector.load %arg9[%c0_16, %c0_17] : memref<1x128xf32, #tpu.memory_space<vmem>>, vector<1x128xf32>
      %c0_18 = arith.constant 0 : index
      %c0_19 = arith.constant 0 : index
      %27 = vector.load %arg8[%c0_18, %c0_19] : memref<1x128xf32, #tpu.memory_space<vmem>>, vector<1x128xf32>
      %cst_20 = arith.constant 0.000000e+00 : f32
      %28 = vector.broadcast %cst_20 : f32 to vector<1x128xf32>
      %29 = arith.maximumf %27, %28 : vector<1x128xf32>
      %30 = math.absf %27 : vector<1x128xf32>
      %cst_21 = arith.constant 0.000000e+00 : f32
      %31 = vector.broadcast %cst_21 : f32 to vector<1x128xf32>
      %32 = arith.subf %31, %30 : vector<1x128xf32>
      %33 = math.exp %32 : vector<1x128xf32>
      %34 = math.log1p %33 : vector<1x128xf32>
      %35 = arith.addf %29, %34 : vector<1x128xf32>
      %36 = arith.mulf %26, %35 : vector<1x128xf32>
      %37 = arith.addf %25, %36 : vector<1x128xf32>
      %38 = vector.broadcast %37 : vector<1x128xf32> to vector<64x128xf32>
      %39 = arith.addf %15, %38 : vector<64x128xf32>
      %c0_22 = arith.constant 0 : index
      %c0_23 = arith.constant 0 : index
      %40 = vector.load %arg10[%c0_22, %c0_23] : memref<64x128xf32, #tpu.memory_space<vmem>>, vector<64x128xf32>
      tpu.vector_store %arg10[%c0_22, %c0_23], %39 {strides = array<i32>} : memref<64x128xf32, #tpu.memory_space<vmem>>, vector<64x128xf32>,
    } else {
    }
    %c0_i32_10 = arith.constant 0 : i32
    %19 = arith.cmpi ne, %arg2, %c0_i32_10 : i32
    %20 = arith.extui %19 : i1 to i32
    %c0_i32_11 = arith.constant 0 : i32
    %21 = arith.cmpi ne, %20, %c0_i32_11 : i32
    scf.if %21 {
      %c0_14 = arith.constant 0 : index
      %c0_15 = arith.constant 0 : index
      %25 = vector.load %arg10[%c0_14, %c0_15] : memref<64x128xf32, #tpu.memory_space<vmem>>, vector<64x128xf32>
      %26 = arith.addf %25, %15 : vector<64x128xf32>
      %c0_16 = arith.constant 0 : index
      %c0_17 = arith.constant 0 : index
      %27 = vector.load %arg10[%c0_16, %c0_17] : memref<64x128xf32, #tpu.memory_space<vmem>>, vector<64x128xf32>
      tpu.vector_store %arg10[%c0_16, %c0_17], %26 {strides = array<i32>} : memref<64x128xf32, #tpu.memory_space<vmem>>, vector<64x128xf32>,
    } else {
    }
    %c0_i32_12 = arith.constant 0 : i32
    %22 = arith.cmpi eq, %arg1, %c0_i32_12 : i32
    %23 = arith.extui %22 : i1 to i32
    %c0_i32_13 = arith.constant 0 : i32
    %24 = arith.cmpi ne, %23, %c0_i32_13 : i32
    scf.if %24 {
      %c0_14 = arith.constant 0 : index
      %c0_15 = arith.constant 0 : index
      %25 = vector.load %arg4[%c0_14, %c0_15] : memref<128x128xf32, #tpu.memory_space<vmem>>, vector<128x128xf32>
      %26 = math.log %8 : vector<128x128xf32>
      %cst_16 = arith.constant 0.000000e+00 : f32
      %27 = vector.broadcast %cst_16 : f32 to vector<128x128xf32>
      %28 = arith.subf %27, %26 : vector<128x128xf32>
      %29 = arith.mulf %8, %8 : vector<128x128xf32>
      %30 = arith.mulf %25, %25 : vector<128x128xf32>
      %31 = arith.addf %29, %30 : vector<128x128xf32>
      %cst_17 = arith.constant 5.000000e-01 : f32
      %32 = vector.broadcast %cst_17 : f32 to vector<128x128xf32>
      %33 = arith.mulf %31, %32 : vector<128x128xf32>
      %34 = arith.addf %28, %33 : vector<128x128xf32>
      %cst_18 = arith.constant 5.000000e-01 : f32
      %35 = vector.broadcast %cst_18 : f32 to vector<128x128xf32>
      %36 = arith.subf %34, %35 : vector<128x128xf32>
      %cst_19 = arith.constant dense<0.000000e+00> : vector<128xf32>
      %37 = vector.multi_reduction <add>, %36, %cst_19 [0] : vector<128x128xf32> to vector<128xf32>
      %38 = vector.shape_cast %37 : vector<128xf32> to vector<1x128xf32>
      %c0_i32_20 = arith.constant 0 : i32
      %39 = arith.cmpi eq, %arg2, %c0_i32_20 : i32
      %40 = arith.extui %39 : i1 to i32
      %c0_i32_21 = arith.constant 0 : i32
      %41 = arith.cmpi ne, %40, %c0_i32_21 : i32
      scf.if %41 {
        %c0_24 = arith.constant 0 : index
        %c0_25 = arith.constant 0 : index
        %45 = vector.load %arg8[%c0_24, %c0_25] : memref<1x128xf32, #tpu.memory_space<vmem>>, vector<1x128xf32>
        %cst_26 = arith.constant 0.000000e+00 : f32
        %46 = vector.broadcast %cst_26 : f32 to vector<1x128xf32>
        %47 = arith.maximumf %45, %46 : vector<1x128xf32>
        %48 = math.absf %45 : vector<1x128xf32>
        %cst_27 = arith.constant 0.000000e+00 : f32
        %49 = vector.broadcast %cst_27 : f32 to vector<1x128xf32>
        %50 = arith.subf %49, %48 : vector<1x128xf32>
        %51 = math.exp %50 : vector<1x128xf32>
        %52 = math.log1p %51 : vector<1x128xf32>
        %53 = arith.addf %47, %52 : vector<1x128xf32>
        %c0_28 = arith.constant 0 : index
        %c0_29 = arith.constant 0 : index
        %54 = vector.load %arg7[%c0_28, %c0_29] : memref<1x128xf32, #tpu.memory_space<vmem>>, vector<1x128xf32>
        %55 = math.log %53 : vector<1x128xf32>
        %cst_30 = arith.constant 0.000000e+00 : f32
        %56 = vector.broadcast %cst_30 : f32 to vector<1x128xf32>
        %57 = arith.subf %56, %55 : vector<1x128xf32>
        %58 = arith.mulf %53, %53 : vector<1x128xf32>
        %59 = arith.mulf %54, %54 : vector<1x128xf32>
        %60 = arith.addf %58, %59 : vector<1x128xf32>
        %cst_31 = arith.constant 5.000000e-01 : f32
        %61 = vector.broadcast %cst_31 : f32 to vector<1x128xf32>
        %62 = arith.mulf %60, %61 : vector<1x128xf32>
        %63 = arith.addf %57, %62 : vector<1x128xf32>
        %cst_32 = arith.constant 5.000000e-01 : f32
        %64 = vector.broadcast %cst_32 : f32 to vector<1x128xf32>
        %65 = arith.subf %63, %64 : vector<1x128xf32>
        %cst_33 = arith.constant dense<0.000000e+00> : vector<128xf32>
        %66 = vector.multi_reduction <add>, %65, %cst_33 [0] : vector<1x128xf32> to vector<128xf32>
        %67 = vector.shape_cast %66 : vector<128xf32> to vector<1x128xf32>
        %68 = arith.addf %38, %67 : vector<1x128xf32>
        %69 = vector.shape_cast %68 : vector<1x128xf32> to vector<1x1x128xf32>
        %c0_34 = arith.constant 0 : index
        %c0_35 = arith.constant 0 : index
        %c0_36 = arith.constant 0 : index
        %70 = vector.load %arg11[%c0_34, %c0_35, %c0_36] : memref<1x1x128xf32, #tpu.memory_space<vmem>>, vector<1x1x128xf32>
        tpu.vector_store %arg11[%c0_34, %c0_35, %c0_36], %69 {strides = array<i32>} : memref<1x1x128xf32, #tpu.memory_space<vmem>>, vector<1x1x128xf32>,
      } else {
      }
      %c0_i32_22 = arith.constant 0 : i32
      %42 = arith.cmpi ne, %arg2, %c0_i32_22 : i32
      %43 = arith.extui %42 : i1 to i32
      %c0_i32_23 = arith.constant 0 : i32
      %44 = arith.cmpi ne, %43, %c0_i32_23 : i32
      scf.if %44 {
        %c0_24 = arith.constant 0 : index
        %c0_25 = arith.constant 0 : index
        %c0_26 = arith.constant 0 : index
        %45 = vector.load %arg11[%c0_24, %c0_25, %c0_26] : memref<1x1x128xf32, #tpu.memory_space<vmem>>, vector<1x1x128xf32>
        %46 = vector.shape_cast %38 : vector<1x128xf32> to vector<1x1x128xf32>
        %47 = arith.addf %45, %46 : vector<1x1x128xf32>
        %c0_27 = arith.constant 0 : index
        %c0_28 = arith.constant 0 : index
        %c0_29 = arith.constant 0 : index
        %48 = vector.load %arg11[%c0_27, %c0_28, %c0_29] : memref<1x1x128xf32, #tpu.memory_space<vmem>>, vector<1x1x128xf32>
        tpu.vector_store %arg11[%c0_27, %c0_28, %c0_29], %47 {strides = array<i32>} : memref<1x1x128xf32, #tpu.memory_space<vmem>>, vector<1x1x128xf32>,
      } else {
      }
    } else {
    }
    return
  }
  func.func @transform_0(%arg0: i32, %arg1: i32, %arg2: i32) -> (i32, i32) {
    %c0_i32 = arith.constant 0 : i32
    return %arg1, %arg2 : i32, i32
  }
  func.func @transform_1(%arg0: i32, %arg1: i32, %arg2: i32) -> (i32, i32) {
    %c0_i32 = arith.constant 0 : i32
    return %arg2, %arg0 : i32, i32
  }
  func.func @transform_2(%arg0: i32, %arg1: i32, %arg2: i32) -> (i32, i32) {
    %c0_i32 = arith.constant 0 : i32
    return %arg2, %arg0 : i32, i32
  }
  func.func @transform_3(%arg0: i32, %arg1: i32, %arg2: i32) -> (i32, i32) {
    %c0_i32 = arith.constant 0 : i32
    return %arg2, %arg0 : i32, i32
  }
  func.func @transform_4(%arg0: i32, %arg1: i32, %arg2: i32) -> (i32, i32) {
    %c0_i32 = arith.constant 0 : i32
    %c0_i32_0 = arith.constant 0 : i32
    return %c0_i32, %arg0 : i32, i32
  }
  func.func @transform_5(%arg0: i32, %arg1: i32, %arg2: i32) -> (i32, i32) {
    %c0_i32 = arith.constant 0 : i32
    %c0_i32_0 = arith.constant 0 : i32
    return %c0_i32, %arg0 : i32, i32
  }
  func.func @transform_6(%arg0: i32, %arg1: i32, %arg2: i32) -> (i32, i32) {
    %c0_i32 = arith.constant 0 : i32
    %c0_i32_0 = arith.constant 0 : i32
    return %c0_i32, %arg0 : i32, i32
  }
  func.func @transform_7(%arg0: i32, %arg1: i32, %arg2: i32) -> (i32, i32) {
    %c0_i32 = arith.constant 0 : i32
    return %arg1, %arg0 : i32, i32
  }
  func.func @transform_8(%arg0: i32, %arg1: i32, %arg2: i32) -> (i32, i32, i32) {
    %c0_i32 = arith.constant 0 : i32
    %c0_i32_0 = arith.constant 0 : i32
    %c0_i32_1 = arith.constant 0 : i32
    return %arg0, %c0_i32, %c0_i32_0 : i32, i32, i32
  }
}

</mosaic_0001>

<bundles_post_ra>
// kernel: tpu_custom_call.1
= control target key start
LH: loop header
LB: loop body
LE: loop exit
PB: predicated region body
PF: predicated region fallthrough
CT: control target
= control target key end

     0   :  { %s3184_s0 = inlined_call_operand.hbm [shape: bf16[64,256], index: 0, kind: input, shape index: {}]   ;;  %s3185_s1 = inlined_call_operand.hbm [shape: f32[256,256], index: 1, kind: input, shape index: {}]   ;;  %s3186_s2 = inlined_call_operand.hbm [shape: f32[256,256], index: 2, kind: input, shape index: {}]   ;;  %s3187_s3 = inlined_call_operand.hbm [shape: f32[256,256], index: 3, kind: input, shape index: {}]   ;;  %s3188_s4 = inlined_call_operand.vmem [shape: f32[1,256], index: 4, kind: input, shape index: {}]   ;;  %s3189_s5 = inlined_call_operand.vmem [shape: f32[1,256], index: 5, kind: input, shape index: {}]   ;;  %s3190_s6 = inlined_call_operand.vmem [shape: f32[1,256], index: 6, kind: input, shape index: {}]   ;;  %s3191_s7 = inlined_call_operand.hbm [shape: f32[64,256], index: 7, kind: output, shape index: {0}]   ;;  %s3192_s8 = inlined_call_operand.hbm [shape: f32[2,1,128], index: 8, kind: output, shape index: {1}]  }
   0x1   :  { %3219 = sst [smem:[#allocation30_spill]] %s3184_s0 }
   0x2   :  { %3220 = sst [smem:[#allocation31_spill]] %s3185_s1 }
   0x3   :  { %3221 = sst [smem:[#allocation32_spill]] %s3188_s4 }
   0x4   :  { %3222 = sst [smem:[#allocation33_spill]] %s3189_s5 }
   0x5   :  { %3223 = sst [smem:[#allocation34_spill]] %s3190_s6 }
   0x6   :  { %3224 = sst [smem:[#allocation35_spill]] %s3191_s7 }
   0x7   :  { %3225 = sst [smem:[#allocation36_spill]] %s3192_s8 }
   0x8   :  { %14 = vsyncpa [#allocation3], 0 }
   0x9   :  { %16 = vsyncpa [#allocation3 + $0x1], 0 }
   0xa   :  { %17 = vsyncpa [#allocation6], 0 }
   0xb   :  { %19 = vsyncpa [#allocation6 + $0x1], 0 }
   0xc   :  { %20 = vsyncpa [#allocation9], 0 }
   0xd   :  { %22 = vsyncpa [#allocation9 + $0x1], 0 }
   0xe   :  { %23 = vsyncpa [#allocation4], 0 }
   0xf   :  { %25 = vsyncpa [#allocation4 + $0x1], 0 }
  0x10   :  { %26 = vsyncpa [#allocation12], 0 }
  0x11   :  { %28 = vsyncpa [#allocation12 + $0x1], 0  ;;  %s2249_s27 = smov 0   ;;  %s2251_s28 = smov 0  }
  0x12   :  { %s2253_s29 = smov 0   ;;  %s2255_s30 = smov 0  }
  0x13   :  { %s2257_s9 = smov 0   ;;  %s2259_s10 = smov 0  }
  0x14   :  { %s2261_s11 = smov 0   ;;  %s2263_s12 = smov 0  }
  0x15   :  { %s2265_s13 = smov 0   ;;  %s2267_s14 = smov 0  }
  0x16   :  { %s2269_s15 = smov 0   ;;  %s2271_s16 = smov 0  }
  0x17   :  { %s2273_s17 = smov 0   ;;  %s2275_s18 = smov 0  }
  0x18 LB: > { %3226 = sst [smem:[#allocation18_spill]] %s2136_s27  ;;  %s1510_s19 = sadd.s32 4294967294, %s2188_s18   ;;  %s2188_s18 = sphi %s2275_s18, %s34_s18   ;;  %s2184_s17 = sphi %s2273_s17, %s3314_s17   ;;  %s2180_s16 = sphi %s2271_s16, %s3313_s16   ;;  %s2176_s15 = sphi %s2269_s15, %s3312_s15   ;;  %s2172_s14 = sphi %s2267_s14, %s3311_s14   ;;  %s2168_s13 = sphi %s2265_s13, %s3310_s13   ;;  %s2164_s12 = sphi %s2263_s12, %s3322_s12   ;;  %s2160_s11 = sphi %s2261_s11, %s3321_s11   ;;  %s2156_s10 = sphi %s2259_s10, %s3320_s10   ;;  %s2152_s9 = sphi %s2257_s9, %s3319_s9   ;;  %s2148_s30 = sphi %s2255_s30, %s3318_s30   ;;  %s2144_s29 = sphi %s2253_s29, %s3317_s29   ;;  %s2140_s28 = sphi %s2251_s28, %s3316_s28   ;;  %s2136_s27 = sphi %s2249_s27, %s3315_s27  }
  0x19   : > { %3227 = sst [smem:[#allocation19_spill]] %s2144_s29  ;;  %s46_s20 = sadd.s32 1, %s2180_s16 }
  0x1a   : > { %3228 = sst [smem:[#allocation20_spill]] %s2168_s13  ;;  %p47_p0 = scmp.ge.s32.totalorder %s46_s20, 2 }
  0x1b   : > { %3229 = sst [smem:[#allocation21_spill]] %s2172_s14  ;;  %s53_s21 = sadd.s32 1, %s2184_s17 }
  0x1c   : > { %3230 = sst [smem:[#allocation22_spill]] %s2180_s16  ;;  %p3203_p1 = scmp.eq.s32.totalorder %s2188_s18, 0 }
  0x1d   : > { %3231 = sst [smem:[#allocation23_spill]] %s2184_s17  ;;  %s90_s22 = sadd.s32 1, %s2156_s10 }
  0x1e   : > { %s3324_s20 = smov (%p47_p0, %s46_s20), 0  ;;  %s3326_s21 = smov (!%p47_p0, %s53_s21), %s2184_s17 }
  0x1f   : > { %3232 = sst [smem:[#allocation24_spill]] %s3324_s20  ;;  %s2329_s23 = ssub.s32 %s2180_s16, %s3324_s20 }
  0x20   : > { %p97_p2 = scmp.ne.s32.totalorder %s2156_s10, %s2152_s9  ;;  %p55_p3 = scmp.ge.s32.totalorder %s3326_s21, 2 }
  0x21   : > { %s252_s25 = sadd.s32 1, %s2144_s29  ;;  %p268_p8 = scmp.ne.s32.totalorder %s2140_s28, %s2136_s27 }
  0x22   : > { %p2336_p5 = por %p97_p2, %p3203_p1  ;;  %s3328_s21 = smov (%p55_p3, %s3326_s21), 0 }
  0x23   : > { %3234 = sst [smem:[#allocation25_spill]] %s3328_s21  ;;  %s86_s26 = ssub.s32 %s2184_s17, %s3328_s21 }
  0x24   : > { %s87_s20 = sor.u32 %s86_s26, %s2329_s23  ;;  %p250_p9 = scmp.eq.s32.totalorder %s86_s26, 0 }
  0x25   : > { %p88_p10 = scmp.eq.s32.totalorder %s87_s20, 0  ;;  %p269_p11 = scmp.eq.s32.totalorder %s1510_s19, 3 }
  0x26   : > { %s2353_s8 = scalar_select %p250_p9, %s2144_s29, %s252_s25  }
  0x27   : > { %s2356_s7 = scalar_select %p88_p10, %s2156_s10, %s90_s22  }
  0x28   : > { %3235 = sst [smem:[#allocation26_spill]] %s2353_s8  ;;  %p2358_p12 = por %p269_p11, %p268_p8 }
  0x29   : > { %3236 = sst [smem:[#allocation27_spill]] %s2356_s7  ;;  %p3202_p13 = scmp.lt.s32.totalorder %s2188_s18, 4 }
  0x2a   : > { %s3237_s14 = scalar_select %p2358_p12, 1, 0 }
  0x2b   : > { %s338_s6 = sand.u32 1, %s2188_s18   ;;  %s3200_s5 = sand.u32 1, %s2156_s10  }
  0x2c   : > { %3238 = sst [smem:[#allocation28_spill]] %s3237_s14  ;;  %s2367_s21 = sshll.u32 %s3200_s5, 7 }
  0x2d   : > { %s1563_s20 = sshll.u32 %s2180_s16, 5  ;;  %s342_s27 = scalar_lea.vmem [#allocation5], %s2367_s21 }
  0x2e   : > { %s348_s26 = sadd.s32 %s2184_s17, %s1563_s20  ;;  %s351_s19 = sshll.u32 %s342_s27, 4  ;;  %s2374_s19 = int_to_ptr.vmem [resolvable:$true] %s351_s19 }
  0x2f   : > { %s2372_s4 = sshll.u32 %s348_s26, 7  ;;  %s3239_s1 = sld [smem:[#allocation31_spill]] }
  0x30   : > { %p2386_p0 = pnand %p3202_p13, %p2336_p5  ;;  %s2391_s27 = scalar_lea.sflag [#allocation6], %s338_s6 }
  0x32   : > { %s3240_s20 = scalar_select %p2386_p0, 1, 0 }
  0x33   : > { %p2397_p8 = pneg %p2386_p0 }
  0x35   : > { %s2380_s7 = scalar_lea.hbm %s3239_s1, %s2372_s4  ;;  %s1887_s5 = scalar_lea.hbm %s3239_s1, 8192 }
  0x36   : > { %s1882_s26 = scalar_lea.hbm %s2380_s7, 2048  ;;  %p1888_p5 = scmp.lt.u32.totalorder %s2380_s7, %s3239_s1 }
  0x37   : > { %p1883_p3 = scmp.ne.s32.totalorder %s2380_s7, %s1882_s26  ;;  %p1889_p11 = scmp.lt.u32.totalorder %s1887_s5, %s1882_s26 }
  0x38   : > { %p1891_p7 = scmp.lt.u32.totalorder %s1882_s26, %s2380_s7 }
  0x39   : > { %p1885_p9 = pnand %p2397_p8, %p1883_p3  ;;  %p1890_p13 = por %p1889_p11, %p1888_p5 }
  0x3b   : > { %p1886_p10 = pneg %p1885_p9  ;;  %p1892_p6 = por %p1891_p7, %p1890_p13 }
  0x3d   : > { %p1893_p1 = pnand %p1892_p6, %p1886_p10 }
  0x3f   : > { %1896 = shalt.err (!%p1893_p1)
}
  0x40   : > { %s1897_s6 = scalar_lea.vmem %s2374_s19, 2048  ;;  %s2190_s24 = smov [#allocation5]  }
  0x41   : > { %p1898_p3 = scmp.ne.s32.totalorder %s2374_s19, %s1897_s6  ;;  %s1902_s25 = sshll.u32 %s2190_s24, 4  ;;  %s1903_s25 = int_to_ptr.vmem [resolvable:$false] %s1902_s25 }
  0x42   : > { %s1904_s8 = scalar_lea.vmem %s1903_s25, 4096  ;;  %p1905_p2 = scmp.lt.s32.totalorder %s2374_s19, %s1903_s25 }
  0x43   : > { %p1900_p9 = pnand %p1898_p3, %p2397_p8  ;;  %p1906_p12 = scmp.lt.s32.totalorder %s1904_s8, %s1897_s6 }
  0x45   : > { %p1901_p4 = pneg %p1900_p9  ;;  %p1907_p5 = por %p1906_p12, %p1905_p2 }
  0x47   : > { %p1908_p11 = pnand %p1907_p5, %p1901_p4 }
  0x49   : > { %1911 = shalt.err (!%p1908_p11)
}
  0x4a   : > { %s3204_s5 = smov 256   ;;  %s3208_s17 = smov 128  }
  0x4b   : > { %s3206_s26 = smov 8   ;;  %p423_p1 = scmp.lt.s32.totalorder %s2188_s18, 5 }
  0x4c   : > { %1636 = dma.hbm_to_vmem [thread:$0]  (!%p2386_p0), %s2380_s7, 2048, %s2374_s19, %s2391_s27, %s3204_s5, %s3208_s17, %s3206_s26  }
  0x4d   : > { %p3242_p4 = scmp.ge.s32.totalorder %s2188_s18, 1  ;;  %s2432_s24 = sadd.s32 4294967295, %s2188_s18  }
  0x4e   : > { %s62_s25 = sadd.s32 1, %s2168_s13  ;;  %p3244_p7 = scmp.eq.s32.totalorder %s2329_s23, 0 }
  0x4f   : > { %p2427_p6 = pnand %p3242_p4, %p423_p1  ;;  %p69_p12 = scmp.ne.s32.totalorder %s2168_s13, %s2164_s12 }
  0x50   : > { %s2438_s8 = scalar_select %p3244_p7, %s2168_s13, %s62_s25  }
  0x51   : > { %s3243_s6 = scalar_select %p2427_p6, 1, 0 }
  0x52   : > { %3245 = sst [smem:[#allocation29_spill]] %s2438_s8  ;;  %p75_p13 = scmp.ne.s32.totalorder %s2164_s12, %s2160_s11 }
  0x53   : > { %p76_p2 = scmp.eq.s32.totalorder %s2432_s24, 0  ;;  %p263_p10 = scmp.eq.s32.totalorder %s2432_s24, 3 }
  0x54   : > { %p3246_p3 = scmp.eq.s32.totalorder %s2188_s18, 0  ;;  %s315_s7 = sand.u32 1, %s2168_s13  }
  0x55   : > { %p2449_p5 = por %p76_p2, %p75_p13  ;;  %p3248_p11 = scmp.ne.s32.totalorder %s2152_s9, %s2148_s30 }
  0x56   : > { %p71_p9 = por %p3246_p3, %p69_p12  ;;  %p3250_p4 = scmp.ne.s32.totalorder %s2144_s29, %s2140_s28 }
  0x57   : > { %s3247_s19 = scalar_select %p2449_p5, 1, 0 }
  0x58   : > { %p2456_p1 = por %p3248_p11, %p76_p2  ;;  %p2463_p6 = por %p263_p10, %p3250_p4 }
  0x59   : > { %s1513_s11 = sshll.u32 %s315_s7, 5  ;;  %s1514_s25 = sshll.u32 %s2180_s16, 6 }
  0x5a   : > { %s3249_s5 = scalar_select %p2456_p1, 1, 0 }
  0x5b   : > { %s3251_s23 = scalar_select %p2463_p6, 1, 0 }
  0x5c   : > { %s3252_s0 = sld [smem:[#allocation30_spill]]  ;;  %s319_s30 = scalar_lea.vmem [#allocation2], %s1513_s11 }
  0x5d   : > { %s328_s8 = sshll.u32 %s319_s30, 4  ;;  %p3253_p7 = scmp.lt.s32.totalorder %s2188_s18, 4  ;;  %s2479_s8 = int_to_ptr.vmem [resolvable:$true] %s328_s8 }
  0x5e   : > { %s2481_s16 = scalar_lea.sflag [#allocation3], %s315_s7 }
  0x5f   : > { %p2475_p12 = pnand %p3253_p7, %p71_p9 }
  0x61   : > { %p1914_p2 = pneg %p2475_p12 }
  0x62   : > { %s2471_s1 = scalar_lea.hbm %s3252_s0, %s1514_s25  ;;  %s1917_s25 = scalar_lea.hbm %s3252_s0, 1024 }
  0x63   : > { %s1912_s17 = scalar_lea.hbm %s2471_s1, 512  ;;  %p1918_p9 = scmp.lt.u32.totalorder %s2471_s1, %s3252_s0 }
  0x64   : > { %p1913_p13 = scmp.ne.s32.totalorder %s2471_s1, %s1912_s17  ;;  %p1919_p11 = scmp.lt.u32.totalorder %s1917_s25, %s1912_s17 }
  0x65   : > { %p1921_p7 = scmp.lt.u32.totalorder %s1912_s17, %s2471_s1 }
  0x66   : > { %p1915_p10 = pnand %p1914_p2, %p1913_p13  ;;  %p1920_p4 = por %p1919_p11, %p1918_p9 }
  0x68   : > { %p1916_p3 = pneg %p1915_p10  ;;  %p1922_p6 = por %p1921_p7, %p1920_p4 }
  0x6a   : > { %p1923_p1 = pnand %p1922_p6, %p1916_p3 }
  0x6c   : > { %1926 = shalt.err (!%p1923_p1)
}
  0x6d   : > { %s1927_s7 = scalar_lea.vmem %s2479_s8, 512  ;;  %s2194_s26 = smov [#allocation2]  }
  0x6e   : > { %p1928_p13 = scmp.ne.s32.totalorder %s2479_s8, %s1927_s7  ;;  %s1932_s11 = sshll.u32 %s2194_s26, 4  ;;  %s1933_s11 = int_to_ptr.vmem [resolvable:$false] %s1932_s11 }
  0x6f   : > { %s1934_s29 = scalar_lea.vmem %s1933_s11, 1024  ;;  %p1935_p0 = scmp.lt.s32.totalorder %s2479_s8, %s1933_s11 }
  0x70   : > { %p1930_p10 = pnand %p1928_p13, %p1914_p2  ;;  %p1936_p9 = scmp.lt.s32.totalorder %s1934_s29, %s1927_s7 }
  0x72   : > { %p1931_p5 = pneg %p1930_p10  ;;  %p1937_p11 = por %p1936_p9, %p1935_p0 }
  0x74   : > { %p1938_p4 = pnand %p1937_p11, %p1931_p5 }
  0x76   : > { %1941 = shalt.err (!%p1938_p4)
}
  0x77   : > { %s2195_s17 = smov 64   ;;  %s2196_s25 = smov 4  }
  0x78   : > { %s3255_s30 = smov 128   ;;  %s2514_s11 = scalar_lea.hbm %s3186_s2, %s2372_s4 }
  0x79   : > { %1633 = dma.hbm_to_vmem [thread:$0]  (!%p2475_p12), %s2471_s1, 512, %s2479_s8, %s2481_s16, %s3255_s30, %s2195_s17, %s2196_s25  }
  0x7a   : > { %s365_s7 = scalar_lea.vmem [#allocation7], %s2367_s21  ;;  %s1942_s14 = scalar_lea.hbm %s2514_s11, 2048 }
  0x7b   : > { %s374_s29 = sshll.u32 %s365_s7, 4  ;;  %p1943_p0 = scmp.ne.s32.totalorder %s2514_s11, %s1942_s14  ;;  %s2517_s29 = int_to_ptr.vmem [resolvable:$true] %s374_s29 }
  0x7c   : > { %s1947_s16 = scalar_lea.hbm %s3186_s2, 8192  ;;  %p1948_p1 = scmp.lt.u32.totalorder %s2514_s11, %s3186_s2 }
  0x7d   : > { %p1945_p6 = pnand %p1943_p0, %p2397_p8  ;;  %p1949_p12 = scmp.lt.u32.totalorder %s1947_s16, %s1942_s14 }
  0x7e   : > { %p1951_p3 = scmp.lt.u32.totalorder %s1942_s14, %s2514_s11 }
  0x7f   : > { %p1946_p5 = pneg %p1945_p6  ;;  %p1950_p2 = por %p1949_p12, %p1948_p1 }
  0x81   : > { %p1952_p7 = por %p1951_p3, %p1950_p2 }
  0x83   : > { %p1953_p13 = pnand %p1952_p7, %p1946_p5 }
  0x85   : > { %1956 = shalt.err (!%p1953_p13)
}
  0x86   : > { %s1957_s17 = scalar_lea.vmem %s2517_s29, 2048  ;;  %s2197_s25 = smov [#allocation7]  }
  0x87   : > { %p1958_p10 = scmp.ne.s32.totalorder %s2517_s29, %s1957_s17  ;;  %s1962_s26 = sshll.u32 %s2197_s25, 4  ;;  %s1963_s26 = int_to_ptr.vmem [resolvable:$false] %s1962_s26 }
  0x88   : > { %s1964_s7 = scalar_lea.vmem %s1963_s26, 4096  ;;  %p1965_p4 = scmp.lt.s32.totalorder %s2517_s29, %s1963_s26 }
  0x89   : > { %p1960_p9 = pnand %p1958_p10, %p2397_p8  ;;  %p1966_p0 = scmp.lt.s32.totalorder %s1964_s7, %s1957_s17 }
  0x8b   : > { %p1961_p11 = pneg %p1960_p9  ;;  %p1967_p6 = por %p1966_p0, %p1965_p4 }
  0x8d   : > { %p1968_p1 = pnand %p1967_p6, %p1961_p11 }
  0x8f   : > { %1971 = shalt.err (!%p1968_p1)
}
  0x90   : > { %p3256_p5 = scmp.ne.s32.totalorder %s3240_s20, 0  ;;  %s3257_s14 = smov 8  }
  0x91   : > { %s3258_s13 = smov 256   ;;  %s2548_s0 = scalar_lea.hbm %s3187_s3, %s2372_s4 }
  0x92   : > { %1639 = dma.hbm_to_vmem [thread:$0]  (!%p3256_p5), %s2514_s11, 2048, %s2517_s29, %s2391_s27, %s3258_s13, %s3255_s30, %s3257_s14  }
  0x93   : > { %s388_s8 = scalar_lea.vmem [#allocation8], %s2367_s21  ;;  %s3259_s25 = sand.u32 1, %s2156_s10  }
  0x94   : > { %s397_s17 = sshll.u32 %s388_s8, 4  ;;  %s2555_s26 = scalar_lea.sflag [#allocation9], %s3259_s25  ;;  %s2551_s17 = int_to_ptr.vmem [resolvable:$true] %s397_s17 }
  0x95   : > { %s1972_s7 = scalar_lea.hbm %s2548_s0, 2048  ;;  %s1977_s4 = scalar_lea.hbm %s3187_s3, 8192 }
  0x96   : > { %p1973_p12 = scmp.ne.s32.totalorder %s2548_s0, %s1972_s7  ;;  %p1978_p7 = scmp.lt.u32.totalorder %s2548_s0, %s3187_s3 }
  0x97   : > { %p1979_p13 = scmp.lt.u32.totalorder %s1977_s4, %s1972_s7  ;;  %p1981_p9 = scmp.lt.u32.totalorder %s1972_s7, %s2548_s0 }
  0x98   : > { %p1975_p2 = pnand %p1973_p12, %p2397_p8 }
  0x99   : > { %p1980_p10 = por %p1979_p13, %p1978_p7 }
  0x9a   : > { %p1976_p3 = pneg %p1975_p2 }
  0x9b   : > { %p1982_p11 = por %p1981_p9, %p1980_p10 }
  0x9d   : > { %p1983_p4 = pnand %p1982_p11, %p1976_p3 }
  0x9f   : > { %1986 = shalt.err (!%p1983_p4)
}
  0xa0   : > { %s1987_s21 = scalar_lea.vmem %s2551_s17, 2048  ;;  %s2198_s16 = smov [#allocation8]  }
  0xa1   : > { %p1988_p0 = scmp.ne.s32.totalorder %s2551_s17, %s1987_s21  ;;  %s1992_s8 = sshll.u32 %s2198_s16, 4  ;;  %s1993_s8 = int_to_ptr.vmem [resolvable:$false] %s1992_s8 }
  0xa2   : > { %s1994_s25 = scalar_lea.vmem %s1993_s8, 4096  ;;  %p1995_p12 = scmp.lt.s32.totalorder %s2551_s17, %s1993_s8 }
  0xa3   : > { %p1990_p6 = pnand %p1988_p0, %p2397_p8  ;;  %p1996_p2 = scmp.lt.s32.totalorder %s1994_s25, %s1987_s21 }
  0xa5   : > { %p1991_p1 = pneg %p1990_p6  ;;  %p1997_p7 = por %p1996_p2, %p1995_p12 }
  0xa7   : > { %p1998_p13 = pnand %p1997_p7, %p1991_p1 }
  0xa9   : > { %2001 = shalt.err (!%p1998_p13)
}
  0xaa   : > { %1642 = dma.hbm_to_vmem [thread:$0]  (!%p3256_p5), %s2548_s0, 2048, %s2551_s17, %s2555_s26, %s3258_s13, %s3255_s30, %s3257_s14  }
  0xab   : > { %p3260_p8 = scmp.ne.s32.totalorder %s3243_s6, 0 }
  0xac   : > { %s429_s22 = sand.u32 (!%p3260_p8), 1, %s2164_s12   ;;  %p3261_p3 = scmp.ne.s32.totalorder (!%p3260_p8), %s3247_s19, 0 }
  0xad   : > { %427 = sbr.rel (%p3260_p8) target bundleno = 676 (0x2a4), region = 48  ;;  %s1528_s7 = sshll.u32 (!%p3260_p8), %s429_s22, 5 }
  0xae   : > { %s430_s27 = scalar_lea.sflag (!%p3260_p8), [#allocation3], %s429_s22  ;;  %s2585_s11 = scalar_lea.vmem (!%p3260_p8), [#allocation2], %s1528_s7 }
  0xb4   : > { %2115 = dma.done.wait (%p3261_p3), %s430_s27, 512  }
  0xb5   : > { %2117 = vsyncadd (%p3261_p3), %s430_s27, 4294966784  ;;  %s438_s20 = sand.u32 1, %s2432_s24   ;;  %s440_s30 = sand.u32 1, %s2152_s9  }
  0xb6   : > { %s1529_s14 = sshll.u32 %s440_s30, 7  ;;  %s439_s6 = scalar_lea.sflag [#allocation6], %s438_s20 }
  0xb7   : > { %s2593_s13 = scalar_lea.vmem [#allocation5], %s1529_s14  ;;  %p3262_p5 = scmp.ne.s32.totalorder %s3249_s5, 0 }
  0xb9   : > { %2119 = dma.done.wait (%p3262_p5), %s439_s6, 4096  }
  0xba   : > { %2121 = vsyncadd (%p3262_p5), %s439_s6, 4294963200  ;;  %s2599_s0 = scalar_lea.vmem [#allocation7], %s1529_s14  ;;  %s457_s17 = scalar_lea.sflag [#allocation9], %s440_s30 }
  0xbb   : > { %s2601_s19 = scalar_lea.vmem [#allocation8], %s1529_s14 }
  0xbc   : > { %2123 = dma.done.wait (%p3262_p5), %s457_s17, 2048  }
  0xbd   : > { %2125 = vsyncadd (%p3262_p5), %s457_s17, 4294965248  ;;  %s2608_s24 = sand.u32 1, %s2140_s28   ;;  %p525_p10 = scmp.lt.s32.totalorder %s2176_s15, 1  ;;  %v2632_v0 = vld [vmem:[%s2599_s0] sm:$0xff]  ;;  %v2635_v1 = vld [vmem:[%s2599_s0 + $0x8] sm:$0xff] }
  0xbe   : > { %s1532_s26 = sshll.u32 %s2608_s24, 6  ;;  %s3263_s21 = sld [smem:[#allocation32_spill]]  ;;  %v568_v2 = vand.u32 2147483647, %v2632_v0  ;;  %v569_v3 = vand.u32 2147483647, %v2635_v1 }
  0xbf   : > { %s2613_s4 = scalar_select %p525_p10, %s2176_s15, 1  ;;  %v2640_v6 = vld [vmem:[%s2599_s0 + $0x10] sm:$0xff]  ;;  %v2643_v7 = vld [vmem:[%s2599_s0 + $0x18] sm:$0xff]  ;;  %v2648_v14 = vld [vmem:[%s2599_s0 + $0x20] sm:$0xff]  ;;  %v552_v35 = vmax.f32 %v2632_v0, 0.0  ;;  %v553_v36 = vmax.f32 %v2635_v1, 0.0 }
  0xc0   : > { %s3264_s25 = sld [smem:[#allocation33_spill]]  ;;  %s3265_s20 = sld [smem:[#allocation34_spill]]  ;;  %v584_v4 = vsub.f32 0.0, %v568_v2  ;;  %v585_v5 = vsub.f32 0.0, %v569_v3  ;;  %v570_v8 = vand.u32 2147483647, %v2640_v6 }
  0xc1   : > { %v571_v9 = vand.u32 2147483647, %v2643_v7  ;;  %v2651_v15 = vld [vmem:[%s2599_s0 + $0x28] sm:$0xff]  ;;  %v572_v16 = vand.u32 2147483647, %v2648_v14  ;;  %v2656_v21 = vld [vmem:[%s2599_s0 + $0x30] sm:$0xff] }
  0xc2   : > { %v600_v10 = vmul.f32 1.442695, %v584_v4  ;;  %v602_v11 = vmul.f32 1.442695, %v585_v5  ;;  %v586_v12 = vsub.f32 0.0, %v570_v8  ;;  %v2659_v23 = vld [vmem:[%s2599_s0 + $0x38] sm:$0xff] }
  0xc3   : > { %v587_v13 = vsub.f32 0.0, %v571_v9  ;;  %v573_v19 = vand.u32 2147483647, %v2651_v15  ;;  %v588_v20 = vsub.f32 0.0, %v572_v16  ;;  %v574_v24 = vand.u32 2147483647, %v2656_v21 }
  0xc4   : > { %s2619_s5 = scalar_lea.vmem %s3263_s21, %s2613_s4  ;;  %1776 = vpow2.f32 %v600_v10  ;;  %v604_v17 = vmul.f32 1.442695, %v586_v12  ;;  %v575_v26 = vand.u32 2147483647, %v2659_v23  ;;  %v2664_v29 = vld [vmem:[%s2599_s0 + $0x40] sm:$0xff]  ;;  %v2667_v31 = vld [vmem:[%s2599_s0 + $0x48] sm:$0xff] }
  0xc5   : > { %1778 = vpow2.f32 %v602_v11  ;;  %v606_v18 = vmul.f32 1.442695, %v587_v13  ;;  %v589_v22 = vsub.f32 0.0, %v573_v19  ;;  %v608_v25 = vmul.f32 1.442695, %v588_v20  ;;  %v2678_v46 = vld [vmem:[%s2599_s0 + $0x50] sm:$0xff] }
  0xc6   : > { %s2625_s22 = scalar_lea.vmem %s3264_s25, %s2613_s4  ;;  %s533_s30 = scalar_lea.vmem %s3265_s20, %s2613_s4  ;;  %1780 = vpow2.f32 %v604_v17  ;;  %v590_v28 = vsub.f32 0.0, %v574_v24  ;;  %v591_v30 = vsub.f32 0.0, %v575_v26  ;;  %v576_v32 = vand.u32 2147483647, %v2664_v29  ;;  %v2681_v47 = vld [vmem:[%s2599_s0 + $0x58] sm:$0xff] }
  0xc7   : > { %1782 = vpow2.f32 %v606_v18  ;;  %v610_v27 = vmul.f32 1.442695, %v589_v22  ;;  %v577_v34 = vand.u32 2147483647, %v2667_v31  ;;  %v554_v39 = vmax.f32 %v2640_v6, 0.0  ;;  %v811_v19 = vld [vmem:[%s2601_s19 + $0x18] sm:$0xff] }
  0xc8   : > { %1784 = vpow2.f32 %v608_v25  ;;  %v612_v33 = vmul.f32 1.442695, %v590_v28  ;;  %v614_v37 = vmul.f32 1.442695, %v591_v30  ;;  %v592_v38 = vsub.f32 0.0, %v576_v32  ;;  %v1772_v28 = vld [vmem:[%s2585_s11] sm:$0xff]  }
  0xc9   : > { %1786 = vpow2.f32 %v610_v27  ;;  %v555_v40 = vmax.f32 %v2643_v7, 0.0  ;;  %v556_v41 = vmax.f32 %v2648_v14, 0.0  ;;  %v557_v43 = vmax.f32 %v2651_v15, 0.0  ;;  %1594 = vmatprep.mubr.bf16.mxu0 %v1772_v28  ;;  %v795_v6 = vld [vmem:[%s2593_s13 + $0x18] sm:$0xff]  ;;  %s2926_s14 = scalar_lea.vmem [#allocation10], %s1532_s26  ;;  %s2929_s6 = scalar_lea.vmem [#allocation11], %s2608_s24 }
  0xca   : > { %1788 = vpow2.f32 %v612_v33  ;;  %v593_v44 = vsub.f32 0.0, %v577_v34  ;;  %v616_v45 = vmul.f32 1.442695, %v592_v38  ;;  %v558_v52 = vmax.f32 %v2656_v21, 0.0  ;;  %v1773_v38 = vld [vmem:[%s2585_s11 + $0x10] sm:$0xff]   ;;  %v2812_v21 = vld [vmem:[%s2599_s0 + $0x60] sm:$0xff] }
  0xcb   : > { %1790 = vpow2.f32 %v614_v37  ;;  %v559_v55 = vmax.f32 %v2659_v23, 0.0  ;;  %v578_v58 = vand.u32 2147483647, %v2678_v46  ;;  %v579_v59 = vand.u32 2147483647, %v2681_v47  ;;  %1598 = vmatprep.mubr.bf16.mxu1 %v1773_v38  ;;  %v2824_v23 = vld [vmem:[%s2599_s0 + $0x70] sm:$0xff] }
  0xcc   : > { %1792 = vpow2.f32 %v616_v45  ;;  %v618_v63 = vmul.f32 1.442695, %v593_v44 }
  0xcd   : > { %v2695_v17 = vsub.f32 0.0, %v578_v58  ;;  %v595_v34 = vsub.f32 0.0, %v579_v59 }
  0xce   : > { %v1777_v42 = vpop.eup %1776 }
  0xcf   : > { %v1779_v48 = vpop.eup %1778  ;;  %v632_v49 = vadd.f32 1.0, %v1777_v42  ;;  %v635_v50 = vmul.f32 -0.5, %v1777_v42  ;;  %v638_v51 = vand.u32 2147483647, %v1777_v42  ;;  %v620_v59 = vmul.f32 1.442695, %v2695_v17 }
  0xd0   : > { %v641_v53 = vadd.f32 1.0, %v1779_v48  ;;  %v644_v54 = vmul.f32 -0.5, %v1779_v48  ;;  %v1781_v56 = vpop.eup %1780  ;;  %v647_v57 = vand.u32 2147483647, %v1779_v48 }
  0xd1   : > { %1794 = vlog2.f32 %v632_v49  ;;  %v1783_v60 = vpop.eup %1782  ;;  %v636_v61 = vadd.f32 1.0, %v635_v50  ;;  %v650_v62 = vadd.f32 1.0, %v1781_v56  ;;  %vm2687_vm0 = vcmp.lt.f32.partialorder %v638_v51, 0.0004427343 }
  0xd2   : > { %1796 = vlog2.f32 %v641_v53  ;;  %v653_v3 = vmul.f32 -0.5, %v1781_v56  ;;  %v656_v4 = vand.u32 2147483647, %v1781_v56  ;;  %v659_v5 = vadd.f32 1.0, %v1783_v60  ;;  %v1785_v8 = vpop.eup %1784 }
  0xd3   : > { %v645_v9 = vadd.f32 1.0, %v644_v54  ;;  %1798 = vlog2.f32 %v650_v62  ;;  %v662_v10 = vmul.f32 -0.5, %v1783_v60  ;;  %v665_v11 = vand.u32 2147483647, %v1783_v60  ;;  %v1787_v12 = vpop.eup %1786 }
  0xd4   : > { %vm2691_vm1 = vcmp.lt.f32.partialorder %v647_v57, 0.0004427343  ;;  %1800 = vlog2.f32 %v659_v5  ;;  %v668_v16 = vadd.f32 1.0, %v1785_v8  ;;  %v654_v18 = vadd.f32 1.0, %v653_v3  ;;  %v1789_v24 = vpop.eup %1788 }
  0xd5   : > { %vm2697_vm2 = vcmp.lt.f32.partialorder %v656_v4, 0.0004427343  ;;  %v671_v20 = vmul.f32 -0.5, %v1785_v8  ;;  %v674_v22 = vand.u32 2147483647, %v1785_v8  ;;  %v663_v25 = vadd.f32 1.0, %v662_v10  ;;  %v2702_v30 = vpop.eup %1790 }
  0xd6   : > { %1802 = vlog2.f32 %v668_v16  ;;  %v677_v26 = vadd.f32 1.0, %v1787_v12  ;;  %v680_v27 = vmul.f32 -0.5, %v1787_v12  ;;  %v637_v32 = vmul.f32 %v1777_v42, %v636_v61  ;;  %v2709_v50 = vpop.eup %1792  ;;  %v808_v4 = vld [vmem:[%s2601_s19] sm:$0xff]  ;;  %v809_v10 = vld [vmem:[%s2601_s19 + $0x8] sm:$0xff] }
  0xd7   : > { %v646_v33 = vmul.f32 %v1779_v48, %v645_v9  ;;  %vm2704_vm3 = vcmp.lt.f32.partialorder %v665_v11, 0.0004427343  ;;  %v683_v37 = vand.u32 2147483647, %v1787_v12  ;;  %v672_v44 = vadd.f32 1.0, %v671_v20 }
  0xd8   : > { %1804 = vlog2.f32 %v677_v26  ;;  %v686_v45 = vadd.f32 1.0, %v1789_v24  ;;  %v689_v49 = vmul.f32 -0.5, %v1789_v24  ;;  %v655_v51 = vmul.f32 %v1781_v56, %v654_v18 }
  0xd9   : > { %vm2711_vm4 = vcmp.lt.f32.partialorder %v674_v22, 0.0004427343  ;;  %v692_v42 = vand.u32 2147483647, %v1789_v24  ;;  %v695_v48 = vadd.f32 1.0, %v2702_v30  ;;  %v664_v57 = vmul.f32 %v1783_v60, %v663_v25 }
  0xda   : > { %v681_v58 = vadd.f32 1.0, %v680_v27  ;;  %1806 = vlog2.f32 %v686_v45  ;;  %v698_v61 = vmul.f32 -0.5, %v2702_v30  ;;  %vm2718_vm5 = vcmp.lt.f32.partialorder %v683_v37, 0.0004427343  ;;  %v793_v45 = vld [vmem:[%s2593_s13 + $0x8] sm:$0xff] }
  0xdb   : > { %v1795_v54 = vpop.eup %1794  ;;  %v690_v5 = vadd.f32 1.0, %v689_v49  ;;  %1808 = vlog2.f32 %v695_v48  ;;  %v673_v11 = vmul.f32 %v1785_v8, %v672_v44  ;;  %v701_v16 = vand.u32 2147483647, %v2702_v30 }
  0xdc   : > { %v1797_v62 = vpop.eup %1796  ;;  %v634_v3 = vmul.f32 0.6931472, %v1795_v54  ;;  %1810 = vpow2.f32 %v618_v63  ;;  %vm2726_vm6 = vcmp.lt.f32.partialorder %v692_v42, 0.0004427343  ;;  %v699_v22 = vadd.f32 1.0, %v698_v61  ;;  %v794_v54 = vld [vmem:[%s2593_s13 + $0x10] sm:$0xff] }
  0xdd   : > { %v643_v9 = vmul.f32 0.6931472, %v1797_v62  ;;  %v1799_v60 = vpop.eup %1798  ;;  %v704_v25 = vadd.f32 1.0, %v2709_v50  ;;  %v682_v2 = vmul.f32 %v1787_v12, %v681_v58  ;;  %v691_v38 = vmul.f32 %v1789_v24, %v690_v5 }
  0xde   : > { %v640_v18 = vsel %vm2687_vm0, %v637_v32, %v634_v3  ;;  %v1801_v26 = vpop.eup %1800  ;;  %v652_v27 = vmul.f32 0.6931472, %v1799_v60  ;;  %v792_v32 = vld [vmem:[%s2593_s13] sm:$0xff]  ;;  %vm2747_vm7 = vcmp.lt.f32.partialorder %v701_v16, 0.0004427343  ;;  %v707_v1 = vmul.f32 -0.5, %v2709_v50 }
  0xdf   : > { %v649_v8 = vsel %vm2691_vm1, %v646_v33, %v643_v9  ;;  %v2735_v63 = vadd.f32 %v640_v18, %v552_v35  ;;  %v661_v37 = vmul.f32 0.6931472, %v1801_v26  ;;  %1812 = vlog2.f32 %v704_v25  ;;  %v810_v35 = vld [vmem:[%s2601_s19 + $0x10] sm:$0xff]  ;;  %v812_v3 = vld [vmem:[%s2601_s19 + $0x20] sm:$0xff]  ;;  %v813_v16 = vld [vmem:[%s2601_s19 + $0x28] sm:$0xff] }
  0xe0   : > { %v2739_v28 = vadd.f32 %v649_v8, %v553_v36  ;;  %v1803_v44 = vpop.eup %1802  ;;  %v658_v0 = vsel %vm2697_vm2, %v655_v51, %v652_v27  ;;  %v700_v58 = vmul.f32 %v2702_v30, %v699_v22  ;;  %v797_v25 = vld [vmem:[%s2593_s13 + $0x28] sm:$0xff]  ;;  %v710_v26 = vand.u32 2147483647, %v2709_v50 }
  0xe1   : > { %v824_v13 = vmul.f32 %v808_v4, %v2735_v63  ;;  %v667_v24 = vsel %vm2704_vm3, %v664_v57, %v661_v37  ;;  %v2757_v33 = vadd.f32 %v658_v0, %v554_v39  ;;  %v670_v49 = vmul.f32 0.6931472, %v1803_v44  ;;  %v815_v44 = vld [vmem:[%s2601_s19 + $0x38] sm:$0xff] }
  0xe2   : > { %v825_v36 = vmul.f32 %v809_v10, %v2739_v28  ;;  %v1805_v51 = vpop.eup %1804  ;;  %v2762_v48 = vadd.f32 %v667_v24, %v555_v40  ;;  %v708_v4 = vadd.f32 1.0, %v707_v1  ;;  %v622_v27 = vmul.f32 1.442695, %v595_v34 }
  0xe3   : > { %v840_v42 = vadd.f32 %v824_v13, %v792_v32  ;;  %v826_v39 = vmul.f32 %v810_v35, %v2757_v33  ;;  %v676_v61 = vsel %vm2711_vm4, %v673_v11, %v670_v49  ;;  %v679_v62 = vmul.f32 0.6931472, %v1805_v51  ;;  %v796_v11 = vld [vmem:[%s2593_s13 + $0x20] sm:$0xff]  ;;  %v814_v32 = vld [vmem:[%s2601_s19 + $0x30] sm:$0xff]  ;;  %v2828_v49 = vld [vmem:[%s2599_s0 + $0x78] sm:$0xff] }
  0xe4   : > { %v841_v57 = vadd.f32 %v825_v36, %v793_v45  ;;  %v1807_v7 = vpop.eup %1806  ;;  %v827_v40 = vmul.f32 %v811_v19, %v2762_v48  ;;  %v2776_v30 = vadd.f32 %v676_v61, %v556_v41  ;;  %1814 = vpow2.f32 %v620_v59  ;;  %v798_v35 = vld [vmem:[%s2593_s13 + $0x30] sm:$0xff]  ;;  %v799_v36 = vld [vmem:[%s2593_s13 + $0x38] sm:$0xff] }
  0xe5   : > { %v1809_v5 = vpop.eup %1808  ;;  %v842_v10 = vadd.f32 %v826_v39, %v794_v54  ;;  %v685_v53 = vsel %vm2718_vm5, %v682_v2, %v679_v62  ;;  %v688_v60 = vmul.f32 0.6931472, %v1807_v7  ;;  %v709_v45 = vmul.f32 %v2709_v50, %v708_v4 }
  0xe6   : > { %v864_v9 = vpack.c.bf16 %v841_v57, %v840_v42  ;;  %v2783_v18 = vpop.eup %1810  ;;  %v843_v22 = vadd.f32 %v827_v40, %v795_v6  ;;  %v2787_v14 = vadd.f32 %v685_v53, %v557_v43  ;;  %v828_v41 = vmul.f32 %v812_v3, %v2776_v30 }
  0xe7   : > { %v697_v17 = vmul.f32 0.6931472, %v1809_v5  ;;  %v694_v56 = vsel %vm2726_vm6, %v691_v38, %v688_v60  ;;  %v713_v8 = vadd.f32 1.0, %v2783_v18  ;;  %v716_v1 = vmul.f32 -0.5, %v2783_v18 }
  0xe8   : > { %1578 = vmatprep.subr.bf16.mxu0 %v864_v9  ;;  %1602 = vmatprep.subr.bf16.mxu1 %v864_v9  ;;  %v865_v15 = vpack.c.bf16 %v843_v22, %v842_v10  ;;  %v829_v43 = vmul.f32 %v813_v16, %v2787_v14  ;;  %v844_v2 = vadd.f32 %v828_v41, %v796_v11  ;;  %vm2819_vm8 = vcmp.lt.f32.partialorder %v710_v26, 0.0004427343  ;;  %v816_v16 = vld [vmem:[%s2601_s19 + $0x40] sm:$0xff] }
  0xe9   : > { %1579 = vmatpush3.bf16.msra.mxu0 %v864_v9  ;;  %1610 = vmatpush3.bf16.msra.mxu1 %v864_v9  ;;  %v1813_v37 = vpop.eup %1812  ;;  %v703_v20 = vsel %vm2747_vm7, %v700_v58, %v697_v17  ;;  %v2801_v38 = vadd.f32 %v694_v56, %v558_v52  ;;  %1816 = vlog2.f32 %v713_v8  ;;  %v2815_v52 = vld [vmem:[%s2599_s0 + $0x68] sm:$0xff]  ;;  %v560_v42 = vmax.f32 %v2664_v29, 0.0  ;;  %v800_v8 = vld [vmem:[%s2593_s13 + $0x40] sm:$0xff] }
  0xea   : > { %1580 = vmatprep.subr.bf16.mxu0 %v865_v15  ;;  %1603 = vmatprep.subr.bf16.mxu1 %v865_v15  ;;  %v845_v13 = vadd.f32 %v829_v43, %v797_v25  ;;  %v2807_v0 = vadd.f32 %v703_v20, %v559_v55  ;;  %v706_v12 = vmul.f32 0.6931472, %v1813_v37  ;;  %1818 = vpow2.f32 %v622_v27  ;;  %v817_v27 = vld [vmem:[%s2601_s19 + $0x48] sm:$0xff] }
  0xeb   : > { %v830_v50 = vmul.f32 %v814_v32, %v2801_v38  ;;  %v580_v54 = vand.u32 2147483647, %v2812_v21  ;;  %v581_v58 = vand.u32 2147483647, %v2815_v52  ;;  %v717_v6 = vadd.f32 1.0, %v716_v1  ;;  %v801_v32 = vld [vmem:[%s2593_s13 + $0x48] sm:$0xff] }
  0xec   : > { %v866_v55 = vpack.c.bf16 %v845_v13, %v844_v2  ;;  %v831_v19 = vmul.f32 %v815_v44, %v2807_v0  ;;  %v712_v57 = vsel %vm2819_vm8, %v709_v45, %v706_v12  ;;  %v582_v39 = vand.u32 2147483647, %v2824_v23 }
  0xed   : > { %1581 = vmatpush3.bf16.msra.mxu0 %v865_v15  ;;  %1611 = vmatpush3.bf16.msra.mxu1 %v865_v15  ;;  %v846_v51 = vadd.f32 %v830_v50, %v798_v35  ;;  %v719_v61 = vand.u32 2147483647, %v2783_v18  ;;  %v596_v62 = vsub.f32 0.0, %v580_v54  ;;  %v597_v3 = vsub.f32 0.0, %v581_v58  ;;  %v821_v54 = vld [vmem:[%s2601_s19 + $0x68] sm:$0xff] }
  0xee   : > { %1582 = vmatprep.subr.bf16.mxu0 %v866_v55  ;;  %1604 = vmatprep.subr.bf16.mxu1 %v866_v55  ;;  %v847_v34 = vadd.f32 %v831_v19, %v799_v36  ;;  %v583_v29 = vand.u32 2147483647, %v2828_v49  ;;  %v598_v40 = vsub.f32 0.0, %v582_v39  ;;  %v2838_v4 = vadd.f32 %v712_v57, %v560_v42  ;;  %v1815_v10 = vpop.eup %1814 }
  0xef   : > { %v624_v59 = vmul.f32 1.442695, %v596_v62  ;;  %v626_v5 = vmul.f32 1.442695, %v597_v3  ;;  %v561_v53 = vmax.f32 %v2667_v31, 0.0  ;;  %v718_v11 = vmul.f32 %v2783_v18, %v717_v6  ;;  %v818_v3 = vld [vmem:[%s2601_s19 + $0x50] sm:$0xff] }
  0xf0   : > { %v867_v7 = vpack.c.bf16 %v847_v34, %v846_v51  ;;  %v599_v9 = vsub.f32 0.0, %v583_v29  ;;  %vm2843_vm9 = vcmp.lt.f32.partialorder %v719_v61, 0.0004427343  ;;  %v722_v41 = vadd.f32 1.0, %v1815_v10 }
  0xf1   : > { %1583 = vmatpush3.bf16.msra.mxu0 %v866_v55  ;;  %1612 = vmatpush3.bf16.msra.mxu1 %v866_v55  ;;  %1820 = vpow2.f32 %v624_v59  ;;  %v628_v17 = vmul.f32 1.442695, %v598_v40  ;;  %v832_v31 = vmul.f32 %v816_v16, %v2838_v4  ;;  %v725_v15 = vmul.f32 -0.5, %v1815_v10 }
  0xf2   : > { %1584 = vmatprep.subr.bf16.mxu0 %v867_v7  ;;  %1605 = vmatprep.subr.bf16.mxu1 %v867_v7  ;;  %1822 = vpow2.f32 %v626_v5  ;;  %v630_v18 = vmul.f32 1.442695, %v599_v9  ;;  %v728_v35 = vand.u32 2147483647, %v1815_v10  ;;  %v562_v42 = vmax.f32 %v2678_v46, 0.0 }
  0xf3   : > { %v1817_v60 = vpop.eup %1816  ;;  %1824 = vlog2.f32 %v722_v41  ;;  %v848_v20 = vadd.f32 %v832_v31, %v800_v8  ;;  %v726_v45 = vadd.f32 1.0, %v725_v15  ;;  %v563_v6 = vmax.f32 %v2681_v47, 0.0 }
  0xf4   : > { %v715_v25 = vmul.f32 0.6931472, %v1817_v60  ;;  %v1819_v56 = vpop.eup %1818  ;;  %1826 = vpow2.f32 %v628_v17  ;;  %vm2857_vm10 = vcmp.lt.f32.partialorder %v728_v35, 0.0004427343  ;;  %v564_v8 = vmax.f32 %v2812_v21, 0.0 }
  0xf5   : > { %1585 = vmatpush3.bf16.msra.mxu0 %v867_v7  ;;  %1613 = vmatpush3.bf16.msra.mxu1 %v867_v7  ;;  %v731_v43 = vadd.f32 1.0, %v1819_v56  ;;  %v734_v44 = vmul.f32 -0.5, %v1819_v56  ;;  %v727_v24 = vmul.f32 %v1815_v10, %v726_v45  ;;  %v737_v55 = vand.u32 2147483647, %v1819_v56  ;;  %v802_v10 = vld [vmem:[%s2593_s13 + $0x50] sm:$0xff] }
  0xf6   : > { %v721_v26 = vsel %vm2843_vm9, %v718_v11, %v715_v25  ;;  %v803_v25 = vld [vmem:[%s2593_s13 + $0x58] sm:$0xff] }
  0xf7   : > { %v2852_v2 = vadd.f32 %v721_v26, %v561_v53  ;;  %1828 = vlog2.f32 %v731_v43  ;;  %v735_v36 = vadd.f32 1.0, %v734_v44  ;;  %vm738_vm11 = vcmp.lt.f32.partialorder %v737_v55, 0.0004427343  ;;  %v819_v53 = vld [vmem:[%s2601_s19 + $0x58] sm:$0xff] }
  0xf8   : > { %1830 = vpow2.f32 %v630_v18 }
  0xf9   : > { %v833_v37 = vmul.f32 %v817_v27, %v2852_v2  ;;  %v736_v39 = vmul.f32 %v1819_v56, %v735_v36 }
  0xfb   : > { %v849_v13 = vadd.f32 %v833_v37, %v801_v32  ;;  %v1821_v12 = vpop.eup %1820 }
  0xfc   : > { %v1823_v50 = vpop.eup %1822  ;;  %v740_v19 = vadd.f32 1.0, %v1821_v12  ;;  %v743_v61 = vmul.f32 -0.5, %v1821_v12  ;;  %v746_v41 = vand.u32 2147483647, %v1821_v12 }
  0xfd   : > { %v868_v1 = vpack.c.bf16 %v849_v13, %v848_v20  ;;  %v1825_v51 = vpop.eup %1824  ;;  %v749_v58 = vadd.f32 1.0, %v1823_v50  ;;  %v752_v29 = vmul.f32 -0.5, %v1823_v50  ;;  %v755_v56 = vand.u32 2147483647, %v1823_v50 }
  0xfe   : > { %v724_v34 = vmul.f32 0.6931472, %v1825_v51  ;;  %1832 = vlog2.f32 %v740_v19  ;;  %v1827_v57 = vpop.eup %1826  ;;  %v744_v16 = vadd.f32 1.0, %v743_v61  ;;  %vm2875_vm12 = vcmp.lt.f32.partialorder %v746_v41, 0.0004427343  ;;  %v820_v19 = vld [vmem:[%s2601_s19 + $0x60] sm:$0xff] }
  0xff   : > { %1586 = vmatprep.subr.bf16.mxu0 %v868_v1  ;;  %1606 = vmatprep.subr.bf16.mxu1 %v868_v1  ;;  %1834 = vlog2.f32 %v749_v58  ;;  %v758_v7 = vadd.f32 1.0, %v1827_v57  ;;  %v761_v60 = vmul.f32 -0.5, %v1827_v57  ;;  %v753_v17 = vadd.f32 1.0, %v752_v29 }
 0x100   : > { %1587 = vmatpush3.bf16.msra.mxu0 %v868_v1  ;;  %1614 = vmatpush3.bf16.msra.mxu1 %v868_v1  ;;  %v730_v46 = vsel %vm2857_vm10, %v727_v24, %v724_v34  ;;  %v745_v27 = vmul.f32 %v1821_v12, %v744_v16  ;;  %v764_v44 = vand.u32 2147483647, %v1827_v57  ;;  %v565_v13 = vmax.f32 %v2815_v52, 0.0  ;;  %v823_v16 = vld [vmem:[%s2601_s19 + $0x78] sm:$0xff] }
 0x101   : > { %v1829_v62 = vpop.eup %1828  ;;  %v2865_v5 = vadd.f32 %v730_v46, %v562_v42  ;;  %1836 = vlog2.f32 %v758_v7  ;;  %v762_v15 = vadd.f32 1.0, %v761_v60  ;;  %v754_v20 = vmul.f32 %v1823_v50, %v753_v17  ;;  %v805_v46 = vld [vmem:[%s2593_s13 + $0x68] sm:$0xff]  ;;  %v807_v17 = vld [vmem:[%s2593_s13 + $0x78] sm:$0xff] }
 0x102   : > { %v1831_v40 = vpop.eup %1830  ;;  %v733_v59 = vmul.f32 0.6931472, %v1829_v62  ;;  %vm2880_vm13 = vcmp.lt.f32.partialorder %v755_v56, 0.0004427343  ;;  %v566_v58 = vmax.f32 %v2824_v23, 0.0  ;;  %v567_v23 = vmax.f32 %v2828_v49, 0.0 }
 0x103   : > { %v767_v47 = vadd.f32 1.0, %v1831_v40  ;;  %v834_v11 = vmul.f32 %v818_v3, %v2865_v5  ;;  %v770_v31 = vmul.f32 -0.5, %v1831_v40  ;;  %v773_v24 = vand.u32 2147483647, %v1831_v40 }
 0x104   : > { %v739_v9 = vsel %vm738_vm11, %v736_v39, %v733_v59  ;;  %v763_v50 = vmul.f32 %v1827_v57, %v762_v15  ;;  %vm2893_vm14 = vcmp.lt.f32.partialorder %v764_v44, 0.0004427343 }
 0x105   : > { %v2870_v22 = vadd.f32 %v739_v9, %v563_v6  ;;  %1838 = vlog2.f32 %v767_v47  ;;  %v850_v26 = vadd.f32 %v834_v11, %v802_v10  ;;  %v771_v21 = vadd.f32 1.0, %v770_v31  ;;  %v804_v6 = vld [vmem:[%s2593_s13 + $0x60] sm:$0xff]  ;;  %v822_v47 = vld [vmem:[%s2601_s19 + $0x70] sm:$0xff] }
 0x106   : > { %vm774_vm15 = vcmp.lt.f32.partialorder %v773_v24, 0.0004427343  ;;  %v806_v11 = vld [vmem:[%s2593_s13 + $0x70] sm:$0xff] }
 0x107   : > { %v835_v18 = vmul.f32 %v819_v53, %v2870_v22  ;;  %v772_v61 = vmul.f32 %v1831_v40, %v771_v21 }
 0x108   : > { %v1833_v43 = vpop.eup %1832 }
 0x109   : > { %v851_v32 = vadd.f32 %v835_v18, %v803_v25  ;;  %v1835_v45 = vpop.eup %1834  ;;  %v742_v35 = vmul.f32 0.6931472, %v1833_v43 }
 0x10a   : > { %v751_v36 = vmul.f32 0.6931472, %v1835_v45 }
 0x10b   : > { %v869_v12 = vpack.c.bf16 %v851_v32, %v850_v26  ;;  %v748_v55 = vsel %vm2875_vm12, %v745_v27, %v742_v35  ;;  %v1837_v51 = vpop.eup %1836  ;;  %v1774_v26 = vld [vmem:[%s2585_s11 + $0x8] sm:$0xff]  }
 0x10c   : > { %v757_v52 = vsel %vm2880_vm13, %v754_v20, %v751_v36  ;;  %v2889_v42 = vadd.f32 %v748_v55, %v564_v8  ;;  %v760_v39 = vmul.f32 0.6931472, %v1837_v51  ;;  %v1775_v8 = vld [vmem:[%s2585_s11 + $0x18] sm:$0xff]   ;;  %s3294_s11 = sld [smem:[#allocation21_spill]] }
 0x10d   : > { %1588 = vmatprep.subr.bf16.mxu0 %v869_v12  ;;  %1607 = vmatprep.subr.bf16.mxu1 %v869_v12  ;;  %v2897_v57 = vadd.f32 %v757_v52, %v565_v13 }
 0x10e   : > { %1589 = vmatpush3.bf16.msra.mxu0 %v869_v12  ;;  %1615 = vmatpush3.bf16.msra.mxu1 %v869_v12  ;;  %v836_v3 = vmul.f32 %v820_v19, %v2889_v42  ;;  %v766_v7 = vsel %vm2893_vm14, %v763_v50, %v760_v39 }
 0x10f   : > { %v1839_v62 = vpop.eup %1838  ;;  %v837_v29 = vmul.f32 %v821_v54, %v2897_v57  ;;  %v2907_v10 = vadd.f32 %v766_v7, %v566_v58 }
 0x110   : > { %v769_v59 = vmul.f32 0.6931472, %v1839_v62  ;;  %v852_v9 = vadd.f32 %v836_v3, %v804_v6 }
 0x111   : > { %v853_v53 = vadd.f32 %v837_v29, %v805_v46  ;;  %v838_v49 = vmul.f32 %v822_v47, %v2907_v10 }
 0x112   : > { %v775_v40 = vsel %vm774_vm15, %v772_v61, %v769_v59  ;;  %p1537_p9 = scmp.ne.s32.totalorder %s3294_s11, 0 }
 0x113   : > { %v2911_v60 = vadd.f32 %v775_v40, %v567_v23  ;;  %v870_v41 = vpack.c.bf16 %v853_v53, %v852_v9  ;;  %v854_v56 = vadd.f32 %v838_v49, %v806_v11  ;;  %v967_v13 = vld [vmem:[%s2625_s22] sm:$0x1] (!%p1537_p9)  ;;  %v986_v50 = vlaneseq (!%p1537_p9) }
 0x114   : > { %v969_v35 = vand.u32 (!%p1537_p9), 2147483647, %v967_v13  ;;  %v968_v54 = vmax.f32 (!%p1537_p9), %v967_v13, 0.0  ;;  %v966_v6 = vld [vmem:[%s533_s30] sm:$0x1] (!%p1537_p9) }
 0x115   : > { %v839_v25 = vmul.f32 %v823_v16, %v2911_v60  ;;  %1590 = vmatprep.subr.bf16.mxu0 %v870_v41  ;;  %1608 = vmatprep.subr.bf16.mxu1 %v870_v41  ;;  %v987_v34 = vshrl.u32 (!%p1537_p9), %v986_v50, 7  ;;  %v965_v62 = vld [vmem:[%s2619_s5] sm:$0x1] (!%p1537_p9) }
 0x116   : > { %1591 = vmatpush3.bf16.msra.mxu0 %v870_v41  ;;  %1616 = vmatpush3.bf16.msra.mxu1 %v870_v41  ;;  %v970_v1 = vsub.f32 (!%p1537_p9), 0.0, %v969_v35 }
 0x117   : > { %v855_v31 = vadd.f32 %v839_v25, %v807_v17  ;;  %v988_v3 = vsub.s32 (!%p1537_p9), 0, %v987_v34 }
 0x118   : > { %v971_v21 = vmul.f32 (!%p1537_p9), 1.442695, %v970_v1 }
 0x119   : > { %v871_v18 = vpack.c.bf16 %v855_v31, %v854_v56 }
 0x11a   : > { %1840 = vpow2.f32 (!%p1537_p9), %v971_v21 }
 0x11b   : > { %1592 = vmatprep.subr.bf16.mxu0 %v871_v18  ;;  %1609 = vmatprep.subr.bf16.mxu1 %v871_v18 }
 0x11c   : > { %1593 = vmatpush3.bf16.msra.mxu0 %v871_v18  ;;  %1617 = vmatpush3.bf16.msra.mxu1 %v871_v18 }
 0x11f   : > { %1595 = vmatmul.mubr.bf16.vlgmr.msra.gmra.mrb[0].mxu0 %v1774_v26  ;;  %1599 = vmatmul.mubr.bf16.vlgmr.msra.gmra.mrb[0].mxu1 %v1775_v8 }
 0x124   : > { %v1841_v12 = vpop.eup (!%p1537_p9), %1840 }
 0x125   : > { %v973_v36 = vadd.f32 (!%p1537_p9), 1.0, %v1841_v12  ;;  %v976_v24 = vmul.f32 (!%p1537_p9), -0.5, %v1841_v12  ;;  %v979_v19 = vand.u32 (!%p1537_p9), 2147483647, %v1841_v12 }
 0x127   : > { %1842 = vlog2.f32 (!%p1537_p9), %v973_v36  ;;  %v977_v55 = vadd.f32 (!%p1537_p9), 1.0, %v976_v24  ;;  %vm980_vm0 = vcmp.lt.f32.partialorder (!%p1537_p9), %v979_v19, 0.0004427343 }
 0x129   : > { %v978_v51 = vmul.f32 (!%p1537_p9), %v1841_v12, %v977_v55 }
 0x131   : > { %v1843_v52 = vpop.eup (!%p1537_p9), %1842 }
 0x132   : > { %v975_v58 = vmul.f32 (!%p1537_p9), 0.6931472, %v1843_v52 }
 0x134   : > { %v981_v39 = vsel (!%p1537_p9), %vm980_vm0, %v978_v51, %v975_v58 }
 0x135   : > { %v982_v61 = vadd.f32 (!%p1537_p9), %v981_v39, %v968_v54 }
 0x137   : > { %v983_v46 = vmul.f32 (!%p1537_p9), %v982_v61, %v966_v6 }
 0x139   : > { %v984_v23 = vadd.f32 (!%p1537_p9), %v983_v46, %v965_v62 }
 0x13b   : > { %v989_v29 = vrot.slane (!%p1537_p9), %v984_v23, %v988_v3 }
 0x1ef   : > { %964 = sbr.rel (%p1537_p9) target bundleno = 505 (0x1f9), region = 68 }
 0x1f2   : > { %v1596_v27 = vpop.f32.mrb[0].mxu0  ;;  %v2918_v15 = vpop.f32.mrb[0].mxu1 }
 0x1f3   : > { %v930_v43 = vpop.f32.mrb[1].mxu0  ;;  %v2920_v32 = vpop.f32.mrb[1].mxu1  ;;  %v993_v47 = vadd.f32 (!%p1537_p9), %v1596_v27, %v989_v29  ;;  %v997_v11 = vadd.f32 (!%p1537_p9), %v2918_v15, %v989_v29 }
 0x1f4   : > { %v1597_v37 = vpop.f32.mrb[2].mxu0  ;;  %v2922_v20 = vpop.f32.mrb[2].mxu1  ;;  %v991_v7 = vadd.f32 (!%p1537_p9), %v989_v29, %v930_v43  ;;  %v995_v53 = vadd.f32 (!%p1537_p9), %v989_v29, %v2920_v32 }
 0x1f5   : > { %v933_v44 = vpop.f32.mrb[3].mxu0  ;;  %v949_v45 = vpop.f32.mrb[3].mxu1  ;;  %v994_v9 = vadd.f32 (!%p1537_p9), %v1597_v37, %v989_v29  ;;  %v998_v16 = vadd.f32 (!%p1537_p9), %v2922_v20, %v989_v29  ;;  %1001 = vst [vmem:[%s2926_s14 + $0x10] sm:$0xff] (!%p1537_p9), %v993_v47  ;;  %1005 = vst [vmem:[%s2926_s14 + $0x30] sm:$0xff] (!%p1537_p9), %v997_v11 }
 0x1f6   : > { %v992_v59 = vadd.f32 %v989_v29, %v933_v44  ;;  %v996_v40 = vadd.f32 %v989_v29, %v949_v45  ;;  %999 = vst [vmem:[%s2926_s14] sm:$0xff] %v991_v7  ;;  %1003 = vst [vmem:[%s2926_s14 + $0x20] sm:$0xff] %v995_v53 }
 0x1f7   : > { %1002 = vst [vmem:[%s2926_s14 + $0x18] sm:$0xff] %v994_v9  ;;  %1006 = vst [vmem:[%s2926_s14 + $0x38] sm:$0xff] %v998_v16 }
 0x1f8   : > { %1000 = vst [vmem:[%s2926_s14 + $0x8] sm:$0xff] %v992_v59  ;;  %1004 = vst [vmem:[%s2926_s14 + $0x28] sm:$0xff] %v996_v40 }
 0x1f9 PF: > { %s3296_s26 = sld [smem:[#allocation21_spill]] }
 0x1ff   : > { %p1538_p11 = scmp.eq.s32.totalorder %s3296_s26, 0 }
 0x200   : > { %v1011_v49 = vld [vmem:[%s2926_s14] sm:$0xff] (!%p1538_p11)  ;;  %v1012_v41 = vld [vmem:[%s2926_s14 + $0x8] sm:$0xff] (!%p1538_p11)  ;;  %v1013_v17 = vld [vmem:[%s2926_s14 + $0x10] sm:$0xff] (!%p1538_p11) }
 0x201   : > { %1010 = sbr.rel (%p1538_p11) target bundleno = 520 (0x208), region = 72  ;;  %v1019_v25 = vadd.f32 (!%p1538_p11), %v1011_v49, %v930_v43  ;;  %v1020_v56 = vadd.f32 (!%p1538_p11), %v1012_v41, %v933_v44  ;;  %v1021_v31 = vadd.f32 (!%p1538_p11), %v1596_v27, %v1013_v17  ;;  %v1014_v18 = vld [vmem:[%s2926_s14 + $0x18] sm:$0xff] (!%p1538_p11)  ;;  %v1015_v26 = vld [vmem:[%s2926_s14 + $0x20] sm:$0xff] (!%p1538_p11)  ;;  %v1016_v8 = vld [vmem:[%s2926_s14 + $0x28] sm:$0xff] (!%p1538_p11) }
 0x202   : > { %v1022_v13 = vadd.f32 (!%p1538_p11), %v1597_v37, %v1014_v18  ;;  %v1023_v35 = vadd.f32 (!%p1538_p11), %v1015_v26, %v2920_v32  ;;  %v1024_v1 = vadd.f32 (!%p1538_p11), %v1016_v8, %v949_v45  ;;  %v1017_v21 = vld [vmem:[%s2926_s14 + $0x30] sm:$0xff] (!%p1538_p11)  ;;  %v1018_v12 = vld [vmem:[%s2926_s14 + $0x38] sm:$0xff] (!%p1538_p11) }
 0x203   : > { %1027 = vst [vmem:[%s2926_s14] sm:$0xff] (!%p1538_p11), %v1019_v25  ;;  %1028 = vst [vmem:[%s2926_s14 + $0x8] sm:$0xff] (!%p1538_p11), %v1020_v56  ;;  %v1025_v43 = vadd.f32 (!%p1538_p11), %v2918_v15, %v1017_v21  ;;  %v1026_v44 = vadd.f32 (!%p1538_p11), %v2922_v20, %v1018_v12 }
 0x204   : > { %1029 = vst [vmem:[%s2926_s14 + $0x10] sm:$0xff] (!%p1538_p11), %v1021_v31  ;;  %1030 = vst [vmem:[%s2926_s14 + $0x18] sm:$0xff] (!%p1538_p11), %v1022_v13 }
 0x205   : > { %1031 = vst [vmem:[%s2926_s14 + $0x20] sm:$0xff] (!%p1538_p11), %v1023_v35  ;;  %1032 = vst [vmem:[%s2926_s14 + $0x28] sm:$0xff] (!%p1538_p11), %v1024_v1 }
 0x206   : > { %1033 = vst [vmem:[%s2926_s14 + $0x30] sm:$0xff] (!%p1538_p11), %v1025_v43  ;;  %1034 = vst [vmem:[%s2926_s14 + $0x38] sm:$0xff] (!%p1538_p11), %v1026_v44 }
 0x208 PF: > { %1844 = vlog2.f32 %v2735_v63  ;;  %v1039_v27 = vld [vmem:[%s2593_s13] sm:$0xff]  ;;  %v1040_v15 = vld [vmem:[%s2593_s13 + $0x8] sm:$0xff]  ;;  %v1041_v32 = vld [vmem:[%s2593_s13 + $0x10] sm:$0xff]  ;;  %v1103_v37 = vmul.f32 %v2735_v63, %v2735_v63  ;;  %v1104_v36 = vmul.f32 %v2739_v28, %v2739_v28  ;;  %v1105_v24 = vmul.f32 %v2757_v33, %v2757_v33 }
 0x209   : > { %1846 = vlog2.f32 %v2739_v28  ;;  %v1042_v45 = vld [vmem:[%s2593_s13 + $0x18] sm:$0xff]  ;;  %v1119_v55 = vmul.f32 %v1039_v27, %v1039_v27  ;;  %v1120_v19 = vmul.f32 %v1040_v15, %v1040_v15  ;;  %v1106_v51 = vmul.f32 %v2762_v48, %v2762_v48  ;;  %v1043_v34 = vld [vmem:[%s2593_s13 + $0x20] sm:$0xff]  ;;  %v1044_v39 = vld [vmem:[%s2593_s13 + $0x28] sm:$0xff] }
 0x20a   : > { %1848 = vlog2.f32 %v2757_v33  ;;  %v1107_v63 = vmul.f32 %v2776_v30, %v2776_v30  ;;  %v1108_v52 = vmul.f32 %v2787_v14, %v2787_v14  ;;  %v1109_v28 = vmul.f32 %v2801_v38, %v2801_v38  ;;  %v1046_v49 = vld [vmem:[%s2593_s13 + $0x38] sm:$0xff]  ;;  %v1047_v18 = vld [vmem:[%s2593_s13 + $0x40] sm:$0xff]  ;;  %v1048_v26 = vld [vmem:[%s2593_s13 + $0x48] sm:$0xff] }
 0x20b   : > { %1850 = vlog2.f32 %v2762_v48  ;;  %v3002_v33 = vmul.f32 %v2807_v0, %v2807_v0  ;;  %v1121_v54 = vmul.f32 %v1041_v32, %v1041_v32  ;;  %v1122_v6 = vmul.f32 %v1042_v45, %v1042_v45 }
 0x20c   : > { %1852 = vlog2.f32 %v2776_v30  ;;  %v3007_v30 = vmul.f32 %v2838_v4, %v2838_v4  ;;  %v1136_v61 = vadd.f32 %v1120_v19, %v1104_v36  ;;  %v3017_v46 = vmul.f32 %v2865_v5, %v2865_v5 }
 0x20d   : > { %1854 = vlog2.f32 %v2787_v14  ;;  %v3011_v14 = vmul.f32 %v2852_v2, %v2852_v2  ;;  %v3021_v3 = vmul.f32 %v2870_v22, %v2870_v22  ;;  %v3025_v23 = vmul.f32 %v2889_v42, %v2889_v42 }
 0x20e   : > { %1856 = vlog2.f32 %v2801_v38  ;;  %v3029_v29 = vmul.f32 %v2897_v57, %v2897_v57  ;;  %v1123_v59 = vmul.f32 %v1043_v34, %v1043_v34  ;;  %v1137_v47 = vadd.f32 %v1121_v54, %v1105_v24  ;;  %v1050_v34 = vld [vmem:[%s2593_s13 + $0x58] sm:$0xff] }
 0x20f   : > { %1858 = vlog2.f32 %v2807_v0  ;;  %v1135_v0 = vadd.f32 %v1119_v55, %v1103_v37  ;;  %v1124_v40 = vmul.f32 %v1044_v39, %v1044_v39  ;;  %v1138_v11 = vadd.f32 %v1122_v6, %v1106_v51  ;;  %v1049_v55 = vld [vmem:[%s2593_s13 + $0x50] sm:$0xff] }
 0x210   : > { %1860 = vlog2.f32 %v2838_v4  ;;  %v1045_v4 = vld [vmem:[%s2593_s13 + $0x30] sm:$0xff]  ;;  %v1152_v56 = vmul.f32 0.5, %v1136_v61  ;;  %v3042_v31 = vmul.f32 %v2911_v60, %v2911_v60  ;;  %v1139_v35 = vadd.f32 %v1123_v59, %v1107_v63 }
 0x211   : > { %1862 = vlog2.f32 %v2852_v2  ;;  %v1151_v25 = vmul.f32 0.5, %v1135_v0  ;;  %v3038_v2 = vmul.f32 %v2907_v10, %v2907_v10  ;;  %v1153_v1 = vmul.f32 0.5, %v1137_v47 }
 0x212   : > { %v1845_v20 = vpop.eup %1844  ;;  %1864 = vlog2.f32 %v2865_v5  ;;  %v1125_v5 = vmul.f32 %v1045_v4, %v1045_v4  ;;  %v1140_v43 = vadd.f32 %v1124_v40, %v1108_v52  ;;  %v1154_v15 = vmul.f32 0.5, %v1138_v11  ;;  %v1052_v11 = vld [vmem:[%s2593_s13 + $0x68] sm:$0xff] }
 0x213   : > { %v1847_v50 = vpop.eup %1846  ;;  %v1056_v48 = vmul.f32 0.6931472, %v1845_v20  ;;  %1866 = vlog2.f32 %v2870_v22  ;;  %v1126_v22 = vmul.f32 %v1046_v49, %v1046_v49  ;;  %v1127_v20 = vmul.f32 %v1047_v18, %v1047_v18  ;;  %v1053_v18 = vld [vmem:[%s2593_s13 + $0x70] sm:$0xff] }
 0x214   : > { %v1849_v58 = vpop.eup %1848  ;;  %v1058_v38 = vmul.f32 0.6931472, %v1847_v50  ;;  %1868 = vlog2.f32 %v2889_v42  ;;  %v1128_v45 = vmul.f32 %v1048_v26, %v1048_v26  ;;  %v1141_v36 = vadd.f32 %v1125_v5, %v1109_v28 }
 0x215   : > { %v1851_v62 = vpop.eup %1850  ;;  %v1060_v7 = vmul.f32 0.6931472, %v1849_v58  ;;  %v1087_v53 = vsub.f32 0.0, %v1056_v48  ;;  %1870 = vlog2.f32 %v2897_v57  ;;  %v1155_v51 = vmul.f32 0.5, %v1139_v35 }
 0x216   : > { %v1853_v9 = vpop.eup %1852  ;;  %v1062_v41 = vmul.f32 0.6931472, %v1851_v62  ;;  %v1088_v17 = vsub.f32 0.0, %v1058_v38  ;;  %1872 = vlog2.f32 %v2907_v10  ;;  %v1142_v54 = vadd.f32 %v1126_v22, %v3002_v33  ;;  %v1051_v62 = vld [vmem:[%s2593_s13 + $0x60] sm:$0xff] }
 0x217   : > { %v1855_v16 = vpop.eup %1854  ;;  %v1064_v8 = vmul.f32 0.6931472, %v1853_v9  ;;  %v1089_v13 = vsub.f32 0.0, %v1060_v7  ;;  %v1167_v32 = vadd.f32 %v1151_v25, %v1087_v53  ;;  %v1156_v48 = vmul.f32 0.5, %v1140_v43  ;;  %v1054_v43 = vld [vmem:[%s2593_s13 + $0x78] sm:$0xff] }
 0x218   : > { %v1857_v21 = vpop.eup %1856  ;;  %v1066_v12 = vmul.f32 0.6931472, %v1855_v16  ;;  %v1090_v27 = vsub.f32 0.0, %v1062_v41  ;;  %v1168_v37 = vadd.f32 %v1152_v56, %v1088_v17  ;;  %1874 = vlog2.f32 %v2911_v60 }
 0x219   : > { %v1859_v44 = vpop.eup %1858  ;;  %v1068_v19 = vmul.f32 0.6931472, %v1857_v21  ;;  %v1091_v50 = vsub.f32 0.0, %v1064_v8  ;;  %v1169_v63 = vadd.f32 %v1153_v1, %v1089_v13  ;;  %v1539_v6 = vadd.f32 -0.5, %v1167_v32 }
 0x21a   : > { %v1861_v24 = vpop.eup %1860  ;;  %v1070_v42 = vmul.f32 0.6931472, %v1859_v44  ;;  %v1092_v52 = vsub.f32 0.0, %v1066_v12  ;;  %v1170_v57 = vadd.f32 %v1154_v15, %v1090_v27  ;;  %v1540_v39 = vadd.f32 -0.5, %v1168_v37 }
 0x21b   : > { %v1863_v58 = vpop.eup %1862  ;;  %v1072_v38 = vmul.f32 0.6931472, %v1861_v24  ;;  %v1129_v0 = vmul.f32 %v1049_v55, %v1049_v55  ;;  %v1143_v61 = vadd.f32 %v1127_v20, %v3007_v30  ;;  %v1093_v4 = vsub.f32 0.0, %v1068_v19 }
 0x21c   : > { %v1865_v28 = vpop.eup %1864  ;;  %v1157_v10 = vmul.f32 0.5, %v1141_v36  ;;  %v1171_v7 = vadd.f32 %v1155_v51, %v1091_v50  ;;  %v1541_v59 = vadd.f32 -0.5, %v1169_v63  ;;  %v1074_v47 = vmul.f32 0.6931472, %v1863_v58 }
 0x21d   : > { %v1867_v33 = vpop.eup %1866  ;;  %v1094_v9 = vsub.f32 0.0, %v1070_v42  ;;  %v1130_v53 = vmul.f32 %v1050_v34, %v1050_v34  ;;  %v1144_v40 = vadd.f32 %v1128_v45, %v3011_v14  ;;  %v1158_v16 = vmul.f32 0.5, %v1142_v54 }
 0x21e   : > { %v1172_v49 = vadd.f32 %v1156_v48, %v1092_v52  ;;  %v1542_v41 = vadd.f32 -0.5, %v1170_v57  ;;  %v1199_v60 = vadd.f32 %v1540_v39, %v1539_v6  ;;  %v1869_v17 = vpop.eup %1868  ;;  %v1076_v30 = vmul.f32 0.6931472, %v1865_v28 }
 0x21f   : > { %v1095_v25 = vsub.f32 0.0, %v1072_v38  ;;  %v1131_v56 = vmul.f32 %v1051_v62, %v1051_v62  ;;  %v1145_v5 = vadd.f32 %v1129_v0, %v3017_v46  ;;  %v1159_v26 = vmul.f32 0.5, %v1143_v61  ;;  %v1871_v1 = vpop.eup %1870 }
 0x220   : > { %v1173_v8 = vadd.f32 %v1157_v10, %v1093_v4  ;;  %v1543_v13 = vadd.f32 -0.5, %v1171_v7  ;;  %v1200_v35 = vadd.f32 %v1541_v59, %v1199_v60  ;;  %v1078_v21 = vmul.f32 0.6931472, %v1867_v33  ;;  %v1873_v37 = vpop.eup %1872 }
 0x221   : > { %v1096_v14 = vsub.f32 0.0, %v1074_v47  ;;  %v1132_v12 = vmul.f32 %v1052_v11, %v1052_v11  ;;  %v1146_v22 = vadd.f32 %v1130_v53, %v3021_v3  ;;  %v1160_v44 = vmul.f32 0.5, %v1144_v40 }
 0x222   : > { %v1174_v27 = vadd.f32 %v1158_v16, %v1094_v9  ;;  %v1544_v15 = vadd.f32 -0.5, %v1172_v49  ;;  %v1201_v32 = vadd.f32 %v1542_v41, %v1200_v35  ;;  %v1080_v20 = vmul.f32 0.6931472, %v1869_v17  ;;  %v1875_v51 = vpop.eup %1874 }
 0x223   : > { %v1097_v45 = vsub.f32 0.0, %v1076_v30  ;;  %v1133_v46 = vmul.f32 %v1053_v18, %v1053_v18  ;;  %v1147_v36 = vadd.f32 %v1131_v56, %v3025_v23  ;;  %v1161_v24 = vmul.f32 0.5, %v1145_v5 }
 0x224   : > { %v1175_v55 = vadd.f32 %v1159_v26, %v1095_v25  ;;  %v1545_v19 = vadd.f32 -0.5, %v1173_v8  ;;  %v1202_v50 = vadd.f32 %v1543_v13, %v1201_v32  ;;  %v1082_v63 = vmul.f32 0.6931472, %v1871_v1 }
 0x225   : > { %v1098_v42 = vsub.f32 0.0, %v1078_v21  ;;  %v1134_v52 = vmul.f32 %v1054_v43, %v1054_v43  ;;  %v1148_v3 = vadd.f32 %v1132_v12, %v3029_v29  ;;  %v1162_v54 = vmul.f32 0.5, %v1146_v22 }
 0x226   : > { %v1176_v58 = vadd.f32 %v1160_v44, %v1096_v14  ;;  %v1546_v34 = vadd.f32 -0.5, %v1174_v27  ;;  %v1203_v48 = vadd.f32 %v1544_v15, %v1202_v50  ;;  %v1084_v57 = vmul.f32 0.6931472, %v1873_v37  ;;  %v1223_v44 = vld [vmem:[%s2625_s22] sm:$0x1] (!%p1537_p9) }
 0x227   : > { %v1099_v6 = vsub.f32 0.0, %v1080_v20  ;;  %v1149_v39 = vadd.f32 %v1133_v46, %v3038_v2  ;;  %v1163_v28 = vmul.f32 0.5, %v1147_v36  ;;  %v1177_v23 = vadd.f32 %v1161_v24, %v1097_v45 }
 0x228   : > { %v1547_v38 = vadd.f32 -0.5, %v1175_v55  ;;  %v1204_v0 = vadd.f32 %v1545_v19, %v1203_v48  ;;  %v1086_v61 = vmul.f32 0.6931472, %v1875_v51  ;;  %v1100_v62 = vsub.f32 0.0, %v1082_v63 }
 0x229   : > { %v1150_v4 = vadd.f32 %v1134_v52, %v3042_v31  ;;  %v1164_v10 = vmul.f32 0.5, %v1148_v3  ;;  %v1178_v7 = vadd.f32 %v1162_v54, %v1098_v42  ;;  %v1548_v59 = vadd.f32 -0.5, %v1176_v58  ;;  %v1239_v42 = vld [vmem:[%s2619_s5] sm:$0x1] (!%p1537_p9) }
 0x22a   : > { %v1205_v29 = vadd.f32 %v1546_v34, %v1204_v0  ;;  %v1101_v33 = vsub.f32 0.0, %v1084_v57  ;;  %v1165_v47 = vmul.f32 0.5, %v1149_v39  ;;  %v1179_v9 = vadd.f32 %v1163_v28, %v1099_v6 }
 0x22b   : > { %v1549_v53 = vadd.f32 -0.5, %v1177_v23  ;;  %v1166_v11 = vmul.f32 0.5, %v1150_v4  ;;  %v1102_v16 = vsub.f32 0.0, %v1086_v61  ;;  %v1180_v2 = vadd.f32 %v1164_v10, %v1100_v62 }
 0x22c   : > { %v1206_v40 = vadd.f32 %v1547_v38, %v1205_v29  ;;  %v1550_v49 = vadd.f32 -0.5, %v1178_v7  ;;  %v1181_v60 = vadd.f32 %v1165_v47, %v1101_v33  ;;  %v1551_v17 = vadd.f32 -0.5, %v1179_v9 }
 0x22d   : > { %v1182_v25 = vadd.f32 %v1166_v11, %v1102_v16  ;;  %v1552_v56 = vadd.f32 -0.5, %v1180_v2  ;;  %v1225_v27 = vand.u32 (!%p1537_p9), 2147483647, %v1223_v44  ;;  %v1224_v19 = vmax.f32 (!%p1537_p9), %v1223_v44, 0.0 }
 0x22e   : > { %v1207_v41 = vadd.f32 %v1548_v59, %v1206_v40  ;;  %v1553_v5 = vadd.f32 -0.5, %v1181_v60  ;;  %v1244_v3 = vmul.f32 (!%p1537_p9), %v1239_v42, %v1239_v42 }
 0x22f   : > { %v1554_v26 = vadd.f32 -0.5, %v1182_v25  ;;  %v1226_v15 = vsub.f32 (!%p1537_p9), 0.0, %v1225_v27 }
 0x230   : > { %v1208_v30 = vadd.f32 %v1549_v53, %v1207_v41 }
 0x231   : > { %v1227_v32 = vmul.f32 (!%p1537_p9), 1.442695, %v1226_v15 }
 0x232   : > { %v1209_v31 = vadd.f32 %v1550_v49, %v1208_v30 }
 0x233   : > { %1876 = vpow2.f32 (!%p1537_p9), %v1227_v32 }
 0x234   : > { %v1210_v18 = vadd.f32 %v1551_v17, %v1209_v31 }
 0x236   : > { %v1211_v8 = vadd.f32 %v1552_v56, %v1210_v18 }
 0x238   : > { %v1212_v13 = vadd.f32 %v1553_v5, %v1211_v8 }
 0x23a   : > { %v1213_v35 = vadd.f32 %v1554_v26, %v1212_v13 }
 0x23c   : > { %v1214_v1 = vrot.slane %v1213_v35, 4 }
 0x23d   : > { %v1877_v37 = vpop.eup (!%p1537_p9), %1876 }
 0x23e   : > { %v1215_v21 = vadd.f32 %v1214_v1, %v1213_v35  ;;  %v1229_v20 = vadd.f32 (!%p1537_p9), 1.0, %v1877_v37  ;;  %v1232_v45 = vmul.f32 (!%p1537_p9), -0.5, %v1877_v37  ;;  %v1235_v36 = vand.u32 (!%p1537_p9), 2147483647, %v1877_v37 }
 0x240   : > { %v1216_v14 = vrot.slane %v1215_v21, 2  ;;  %1222 = sbr.rel (%p1537_p9) target bundleno = 614 (0x266), region = 80  ;;  %1878 = vlog2.f32 (!%p1537_p9), %v1229_v20  ;;  %v1233_v46 = vadd.f32 (!%p1537_p9), 1.0, %v1232_v45  ;;  %vm1236_vm1 = vcmp.lt.f32.partialorder (!%p1537_p9), %v1235_v36, 0.0004427343 }
 0x242   : > { %v1217_v12 = vadd.f32 %v1216_v14, %v1215_v21  ;;  %v1234_v24 = vmul.f32 (!%p1537_p9), %v1877_v37, %v1233_v46 }
 0x244   : > { %v1218_v22 = vrot.slane %v1217_v12, 1 }
 0x246   : > { %v1219_v43 = vadd.f32 %v1218_v22, %v1217_v12 }
 0x24a   : > { %v1879_v55 = vpop.eup %1878 }
 0x24b   : > { %v1231_v50 = vmul.f32 0.6931472, %v1879_v55 }
 0x24d   : > { %v1237_v51 = vsel %vm1236_vm1, %v1234_v24, %v1231_v50 }
 0x24e   : > { %v1238_v63 = vadd.f32 %v1237_v51, %v1224_v19 }
 0x250   : > { %1880 = vlog2.f32 %v1238_v63  ;;  %v1243_v52 = vmul.f32 %v1238_v63, %v1238_v63 }
 0x252   : > { %v1245_v54 = vadd.f32 %v1244_v3, %v1243_v52 }
 0x254   : > { %v1246_v48 = vmul.f32 0.5, %v1245_v54 }
 0x25a   : > { %v1881_v58 = vpop.eup %1880 }
 0x25b   : > { %v1241_v34 = vmul.f32 0.6931472, %v1881_v58 }
 0x25d   : > { %v1242_v57 = vsub.f32 0.0, %v1241_v34 }
 0x25f   : > { %v1247_v6 = vadd.f32 %v1246_v48, %v1242_v57 }
 0x261   : > { %v1556_v39 = vadd.f32 -0.5, %v1247_v6 }
 0x263   : > { %v1250_v28 = vadd.f32 %v1556_v39, %v1219_v43 }
 0x265   : > { %1251 = vst [vmem:[%s2929_s6] sm:$0x1] %v1250_v28 }
 0x266 PF: > { %1254 = sbr.rel (%p1538_p11) target bundleno = 624 (0x270), region = 84 }
 0x26c   : > { %v1255_v23 = vld [vmem:[%s2929_s6] sm:$0x1] (!%p1538_p11) }
 0x26d   : > { %v1256_v38 = vadd.f32 %v1255_v23, %v1219_v43 }
 0x26f   : > { %1257 = vst [vmem:[%s2929_s6] sm:$0x1] %v1256_v38 }
 0x270 PF: > { %s1559_s29 = sshll.u32 %s2176_s15, 7  ;;  %s3299_s5 = sld [smem:[#allocation35_spill]] }
 0x271   : > { %s1278_s8 = sshll.u32 %s2926_s14, 4  ;;  %s1259_s25 = scalar_lea.sflag [#allocation4], %s2608_s24  ;;  %s3081_s8 = int_to_ptr.vmem [resolvable:$true] %s1278_s8 }
 0x272   : > { %s2002_s22 = scalar_lea.vmem %s3081_s8, 1024  ;;  %p3300_p0 = scmp.ne.s32.totalorder %s3251_s23, 0 }
 0x273   : > { %p2003_p4 = scmp.ne.s32.totalorder %s3081_s8, %s2002_s22  ;;  %s2199_s7 = smov [#allocation10]  }
 0x274   : > { %s2006_s27 = sshll.u32 %s2199_s7, 4  ;;  %s2007_s27 = int_to_ptr.vmem [resolvable:$false] %s2006_s27 }
 0x275   : > { %p2004_p6 = pnand %p2003_p4, %p3300_p0  ;;  %s2008_s20 = scalar_lea.vmem %s2007_s27, 2048 }
 0x276   : > { %s3078_s16 = scalar_lea.hbm %s3299_s5, %s1559_s29  ;;  %p2009_p12 = scmp.lt.s32.totalorder %s3081_s8, %s2007_s27 }
 0x277   : > { %p2005_p1 = pneg %p2004_p6  ;;  %p2010_p2 = scmp.lt.s32.totalorder %s2008_s20, %s2002_s22 }
 0x279   : > { %p2011_p7 = por %p2010_p2, %p2009_p12 }
 0x27b   : > { %p2012_p13 = pnand %p2011_p7, %p2005_p1 }
 0x27d   : > { %2015 = shalt.err (!%p2012_p13)
}
 0x27e   : > { %s2016_s30 = scalar_lea.hbm %s3078_s16, 1024  ;;  %s2020_s0 = scalar_lea.hbm %s3299_s5, 2048 }
 0x27f   : > { %p2017_p8 = scmp.ne.s32.totalorder %s3078_s16, %s2016_s30  ;;  %p2021_p10 = scmp.lt.u32.totalorder %s3078_s16, %s3299_s5 }
 0x280   : > { %p2022_p9 = scmp.lt.u32.totalorder %s2020_s0, %s2016_s30  ;;  %p2024_p4 = scmp.lt.u32.totalorder %s2016_s30, %s3078_s16 }
 0x281   : > { %p2018_p3 = pnand %p2017_p8, %p3300_p0 }
 0x282   : > { %p2023_p11 = por %p2022_p9, %p2021_p10 }
 0x283   : > { %p2019_p5 = pneg %p2018_p3 }
 0x284   : > { %p2025_p6 = por %p2024_p4, %p2023_p11 }
 0x286   : > { %p2026_p1 = pnand %p2025_p6, %p2019_p5 }
 0x288   : > { %2029 = shalt.err (!%p2026_p1)
}
 0x289   : > { %s2200_s26 = smov 128   ;;  %s2201_s13 = smov 256  }
 0x28a   : > { %s2202_s4 = smov 8   ;;  %s1560_s29 = sshll.u32 %s2176_s15, 4 }
 0x28b   : > { %1626 = dma.vmem_to_hbm [thread:$0]  (%p3300_p0), %s3081_s8, 1024, %s3078_s16, %s1259_s25, %s2200_s26, %s2201_s13, %s2202_s4  }
 0x28c   : > { %s3301_s22 = sld [smem:[#allocation36_spill]]  ;;  %s1294_s27 = sshll.u32 %s2929_s6, 4  ;;  %s1295_s27 = int_to_ptr.vmem [resolvable:$true] %s1294_s27 }
 0x28d   : > { %s1264_s20 = scalar_lea.sflag [#allocation12], %s2608_s24  ;;  %s2030_s30 = scalar_lea.vmem %s1295_s27, 16 }
 0x28e   : > { %p2031_p12 = scmp.ne.s32.totalorder %s1295_s27, %s2030_s30  ;;  %s2203_s14 = smov [#allocation11]  }
 0x28f   : > { %s2034_s11 = sshll.u32 %s2203_s14, 4  ;;  %s2035_s11 = int_to_ptr.vmem [resolvable:$false] %s2034_s11 }
 0x290   : > { %p2032_p2 = pnand %p2031_p12, %p3300_p0  ;;  %s2036_s0 = scalar_lea.vmem %s2035_s11, 32 }
 0x291   : > { %p2037_p13 = scmp.lt.s32.totalorder %s1295_s27, %s2035_s11  ;;  %p2038_p8 = scmp.lt.s32.totalorder %s2036_s0, %s2030_s30 }
 0x292   : > { %s3111_s7 = scalar_lea.hbm %s3301_s22, %s1560_s29  ;;  %p2033_p7 = pneg %p2032_p2 }
 0x293   : > { %p2039_p3 = por %p2038_p8, %p2037_p13 }
 0x295   : > { %p2040_p5 = pnand %p2039_p3, %p2033_p7 }
 0x297   : > { %2043 = shalt.err (!%p2040_p5)
}
 0x298   : > { %s2044_s15 = scalar_lea.hbm %s3111_s7, 16  ;;  %s2048_s16 = scalar_lea.hbm %s3301_s22, 32 }
 0x299   : > { %p2045_p10 = scmp.ne.s32.totalorder %s3111_s7, %s2044_s15  ;;  %p2049_p4 = scmp.lt.u32.totalorder %s3111_s7, %s3301_s22 }
 0x29a   : > { %p2050_p6 = scmp.lt.u32.totalorder %s2048_s16, %s2044_s15  ;;  %p2052_p12 = scmp.lt.u32.totalorder %s2044_s15, %s3111_s7 }
 0x29b   : > { %p2046_p9 = pnand %p2045_p10, %p3300_p0 }
 0x29c   : > { %p2051_p1 = por %p2050_p6, %p2049_p4 }
 0x29d   : > { %p2047_p11 = pneg %p2046_p9 }
 0x29e   : > { %p2053_p2 = por %p2052_p12, %p2051_p1 }
 0x2a0   : > { %p2054_p7 = pnand %p2053_p2, %p2047_p11 }
 0x2a2   : > { %2057 = shalt.err (!%p2054_p7)
}
 0x2a3   : > { %1627 = dma.vmem_to_hbm [thread:$0]  (%p3300_p0), %s1295_s27, 16, %s3111_s7, %s1264_s20  }
 0x2a4 PF: > { %s3302_s17 = sld [smem:[#allocation18_spill]]  ;;  %s3303_s19 = sld [smem:[#allocation28_spill]] }
 0x2a5   : > { %p1651_p13 = scmp.ge.s32.totalorder %s2188_s18, 2 }
 0x2aa   : > { %s1306_s26 = sand.u32 1, %s3302_s17   ;;  %p3304_p8 = scmp.ne.s32.totalorder %s3303_s19, 0 }
 0x2ab   : > { %s1307_s13 = scalar_lea.sflag [#allocation4], %s1306_s26 }
 0x2ac   : > { %p1644_p3 = pnand %p1651_p13, %p3304_p8 }
 0x2ae   : > { %2127 = dma.done.wait (!%p1644_p3), %s1307_s13, 1024  }
 0x2af   : > { %2129 = vsyncadd (!%p1644_p3), %s1307_s13, 4294966272  ;;  %s1316_s4 = scalar_lea.sflag [#allocation12], %s1306_s26 }
 0x2b0   : > { %2131 = dma.done.wait (!%p1644_p3), %s1316_s4, 16  }
 0x2b1   : > { %2133 = vsyncadd (!%p1644_p3), %s1316_s4, 4294967280  ;;  %s34_s18 = sadd.s32 1, %s2188_s18   ;;  %s3306_s29 = sld [smem:[#allocation19_spill]] }
 0x2b2   : > { %p3137_p5 = scmp.ge.s32.totalorder %s34_s18, 6   ;;  %s3307_s1 = sld [smem:[#allocation26_spill]] }
 0x2b3   : > { %s3308_s21 = sld [smem:[#allocation27_spill]]  ;;  %s3309_s7 = sld [smem:[#allocation20_spill]] }
 0x2b4   : > { %s3310_s13 = sld [smem:[#allocation29_spill]]  ;;  %s3311_s14 = sld [smem:[#allocation22_spill]] }
 0x2b5   : > { %s3312_s15 = sld [smem:[#allocation23_spill]]  ;;  %s3313_s16 = sld [smem:[#allocation24_spill]] }
 0x2b6   : > { %s3314_s17 = sld [smem:[#allocation25_spill]]  ;;  %s3315_s27 = smov %s2140_s28 }
 0x2b7   : > { %s3316_s28 = smov %s3306_s29  ;;  %s3318_s30 = smov %s2152_s9 }
 0x2b8   : > { %s3317_s29 = smov %s3307_s1  ;;  %s3319_s9 = smov %s2156_s10 }
 0x2b9   : > { %s3320_s10 = smov %s3308_s21  ;;  %s3321_s11 = smov %s2164_s12 }
 0x2ba   : > { %s3322_s12 = smov %s3309_s7  ;;  %33 = sbr.rel (!%p3137_p5) target bundleno = 24 (0x18), region = 176 }
 0x2c1   :  { %1320 = vsyncpa [#allocation3], 1 }
 0x2c2   :  { %1322 = vsyncpa [#allocation3 + $0x1], 1 }
 0x2c3   :  { %1323 = vsyncpa [#allocation6], 1 }
 0x2c4   :  { %1325 = vsyncpa [#allocation6 + $0x1], 1 }
 0x2c5   :  { %1326 = vsyncpa [#allocation9], 1 }
 0x2c6   :  { %1328 = vsyncpa [#allocation9 + $0x1], 1 }
 0x2c7   :  { %1329 = vsyncpa [#allocation4], 1 }
 0x2c8   :  { %1331 = vsyncpa [#allocation4 + $0x1], 1 }
 0x2c9   :  { %1332 = vsyncpa [#allocation12], 1 }
 0x2ca   :  { %1334 = vsyncpa [#allocation12 + $0x1], 1 }

</bundles_post_ra>
